<compile_context>
chip_gen: v7x
topology: tpu7x:2x2x1
jax: 0.10.0
libtpu: 0.0.40
codegen_flags: <defaults>
</compile_context>

<pallas_src>
import math
import functools

import jax
import jax.numpy as jnp
from jax import lax
from jax.experimental import pallas as pl
from jax.experimental.pallas import tpu as pltpu

# ---- hyper-params from the PyTorch script ----
BLOCK_SIZE = 8      # sequence length T
HEAD_SIZE = 8
EMBED = 32          # embedding_size used by the surrounding model


def head_kernel(x_ref, w_ref, o_ref):
    """Causal attention for one lane-tile of sequences.

    x_ref: (T, C, bt)    activations, batch on lanes
    w_ref: (3*hs, C)     stacked [Wq; Wk; Wv], PyTorch (out, in) layout
    o_ref: (T, hs, bt)   attention output, batch on lanes
    """
    T, C, bt = x_ref.shape
    hs = o_ref.shape[1]
    scale = 1.0 / math.sqrt(hs)

    w = w_ref[...]                                            # (3*hs, C)

    # --- QKV projection: T small MXU dots with the full 128-lane batch as N. ---
    q = []   # per query position t: (hs, bt), pre-scaled by 1/sqrt(hs)
    k = []   # per key   position s: (hs, bt)
    v = []   # per key   position s: (hs, bt)
    for t in range(T):
        qkv_t = jnp.dot(w, x_ref[t], preferred_element_type=jnp.float32)  # (3*hs, bt)
        q.append(qkv_t[0 * hs:1 * hs] * scale)
        k.append(qkv_t[1 * hs:2 * hs])
        v.append(qkv_t[2 * hs:3 * hs])

    # Regroup k to feature-major: k_feat[d][s, :] == k[s][d, :]  -> (T, bt) per feature d.
    # Done once per grid step (64*bt elements of sublane regrouping).
    k_feat = [
        jnp.concatenate([k[s][d:d + 1, :] for s in range(T)], axis=0)     # (T, bt)
        for d in range(hs)
    ]

    # Key-position index on the sublane axis, shared by every query row.
    s_idx = lax.broadcasted_iota(jnp.int32, (T, bt), 0)

    # --- Per query position: scores, causal mask, softmax, p @ v (VPU/XLU/EUP only). ---
    for t in range(T):
        q_t = q[t]                                            # (hs, bt)

        # scores[s, b] = sum_d q[t, d, b] * k[s, d, b]   (batch b on lanes)
        scores = k_feat[0] * q_t[0:1, :]
        for d in range(1, hs):
            scores = scores + k_feat[d] * q_t[d:d + 1, :]     # (T, bt)

        # Causal mask: keep s <= t.  Finite fill (diagonal is always unmasked -> no NaN).
        scores = jnp.where(s_idx <= t, scores, -1e30)

        m = jnp.max(scores, axis=0, keepdims=True)            # (1, bt)
        e = jnp.exp(scores - m)                               # (T, bt)  (EUP)
        denom = jnp.sum(e, axis=0, keepdims=True)             # (1, bt)
        p = e * pl.reciprocal(denom, approx=True)             # (T, bt)  divide on EUP slot

        # out[t, d, b] = sum_{s<=t} p[s, b] * v[s, d, b]   (p[s] == 0 exactly for s > t)
        out_t = p[0:1, :] * v[0]                              # (hs, bt)
        for s in range(1, t + 1):
            out_t = out_t + p[s:s + 1, :] * v[s]
        o_ref[t] = out_t.astype(o_ref.dtype)                  # lane-dense store


def _round_up(n, m):
    return ((n + m - 1) // m) * m


@functools.partial(jax.jit, static_argnames=("b_tile",))
def head_forward(x, w_qkv, *, b_tile=1024):
    """x: (B, T, C); w_qkv: (3*head_size, C) = [Wq; Wk; Wv] stacked in PyTorch
    (out_features, in_features) layout.  Returns (B, T, head_size).

    b_tile = sequences per grid step, rounded to a multiple of 128 so the batch fills
    the lane axis.  The default 1024 gives >= 1 MiB of x per step while per-step VMEM
    stays ~4 MiB (fits every generation's default scoped-VMEM limit).  On v7x keep
    B >= 2*b_tile when possible so the "parallel" batch axis shards across both cores.
    """
    B, T, C = x.shape
    assert T == BLOCK_SIZE, f"T={T} must equal block_size={BLOCK_SIZE}"
    hs = w_qkv.shape[0] // 3
    assert w_qkv.shape == (3 * hs, C), w_qkv.shape

    bt = min(_round_up(b_tile, 128), _round_up(B, 128))
    b_pad = _round_up(B, bt)

    # Batch-on-lanes layout for the kernel: (T, C, B_pad).
    # TODO(synk): in a full model, have the producer of x emit (T, C, B) directly so this
    # transpose (and the output transpose below) is free.
    xt = jnp.transpose(x, (1, 2, 0))
    if b_pad != B:
        xt = jnp.pad(xt, ((0, 0), (0, 0), (0, b_pad - B)))

    out_t = pl.pallas_call(
        head_kernel,
        out_shape=jax.ShapeDtypeStruct((T, hs, b_pad), x.dtype),
        grid_spec=pltpu.PrefetchScalarGridSpec(
            num_scalar_prefetch=0,
            grid=(b_pad // bt,),
            in_specs=[
                pl.BlockSpec((T, C, bt), lambda i: (0, 0, i)),    # batch tile on lanes
                pl.BlockSpec((3 * hs, C), lambda i: (0, 0)),      # fused QKV weights
            ],
            out_specs=pl.BlockSpec((T, hs, bt), lambda i: (0, 0, i)),
        ),
        compiler_params=pltpu.CompilerParams(
            dimension_semantics=("parallel",)),
    )(xt, w_qkv)

    return jnp.transpose(out_t, (2, 0, 1))[:B]


# ---------- pure-JAX reference (PyTorch semantics, PyTorch weight layout) ----------
def head_ref(x, wq, wk, wv):
    T = x.shape[1]
    q = x @ wq.T
    k = x @ wk.T
    v = x @ wv.T
    wei = jnp.einsum("btd,bsd->bts", q, k) / math.sqrt(q.shape[-1])
    mask = jnp.tril(jnp.ones((T, T), bool))
    wei = jnp.where(mask, wei, -jnp.inf)
    p = jax.nn.softmax(wei, axis=-1)
    return jnp.einsum("bts,bsd->btd", p, v)


if __name__ == "__main__":
    key = jax.random.PRNGKey(0)
    kx, kq, kk, kv, kx2 = jax.random.split(key, 5)

    B, T, C, HS = 2, BLOCK_SIZE, EMBED, HEAD_SIZE
    x = jax.random.normal(kx, (B, T, C), jnp.float32)

    # nn.Linear(embed, head_size, bias=False)-style init, stored PyTorch-style (out, in).
    bound = 1.0 / math.sqrt(C)
    wq = jax.random.uniform(kq, (HS, C), jnp.float32, -bound, bound)
    wk = jax.random.uniform(kk, (HS, C), jnp.float32, -bound, bound)
    wv = jax.random.uniform(kv, (HS, C), jnp.float32, -bound, bound)
    w_qkv = jnp.concatenate([wq, wk, wv], axis=0)     # (3*HS, C)

    # Small demo batch (single grid step, batch padded up to one 128-lane tile).
    out = jax.block_until_ready(head_forward(x, w_qkv))
    assert out.shape == (B, T, HS), out.shape
    ref = head_ref(x, wq, wk, wv)
    assert jnp.allclose(out, ref, rtol=2e-2, atol=2e-3), float(jnp.max(jnp.abs(out - ref)))

    # Multi-step grid + batch-padding path (B not a multiple of the lane tile).
    B2 = 300
    x2 = jax.random.normal(kx2, (B2, T, C), jnp.float32)
    out2 = jax.block_until_ready(head_forward(x2, w_qkv, b_tile=128))
    ref2 = head_ref(x2, wq, wk, wv)
    assert out2.shape == (B2, T, HS), out2.shape
    assert jnp.allclose(out2, ref2, rtol=2e-2, atol=2e-3), float(jnp.max(jnp.abs(out2 - ref2)))

    print("KERNEL_OK")
</pallas_src>

<mosaic_0001>
module attributes {stable_mosaic.version = 11 : i64} {
  func.func @head_kernel(%arg0: i32, %arg1: memref<8x32x128xf32, #tpu.memory_space<vmem>>, %arg2: memref<24x32xf32, #tpu.memory_space<vmem>>, %arg3: memref<8x8x128xf32, #tpu.memory_space<vmem>>) attributes {dimension_semantics = [#tpu.dimension_semantics<parallel>], iteration_bounds = array<i64: 1>, scalar_prefetch = 0 : i64, scratch_operands = 0 : i64, tpu.core_type = #tpu.core_type<tc>, window_params = [{transform_indices = @transform_0, window_bounds = array<i64: 8, 32, 128>}, {pipeline_mode = #tpu.pipeline_mode<synchronous>, transform_indices = @transform_1, window_bounds = array<i64: 24, 32>}, {transform_indices = @transform_2, window_bounds = array<i64: 8, 8, 128>}]} {
    %c0 = arith.constant 0 : index
    %c0_0 = arith.constant 0 : index
    %0 = vector.load %arg2[%c0, %c0_0] : memref<24x32xf32, #tpu.memory_space<vmem>>, vector<24x32xf32>
    %c0_1 = arith.constant 0 : index
    %c0_2 = arith.constant 0 : index
    %c0_3 = arith.constant 0 : index
    %1 = vector.load %arg1[%c0_1, %c0_2, %c0_3] : memref<8x32x128xf32, #tpu.memory_space<vmem>>, vector<1x32x128xf32>
    %2 = vector.shape_cast %1 : vector<1x32x128xf32> to vector<32x128xf32>
    %cst = arith.constant dense<0.000000e+00> : vector<24x128xf32>
    %3 = tpu.matmul %0, %2, %cst {dimension_numbers = #tpu.dot_dimension_numbers<[1], [0], [0], [1], [0, 0, 1, 1], [], []>} : vector<24x32xf32>, vector<32x128xf32>, vector<24x128xf32> -> vector<24x128xf32>
    %4 = vector.extract_strided_slice %3 {offsets = [0, 0], sizes = [8, 128], strides = [1, 1]} : vector<24x128xf32> to vector<8x128xf32>
    %cst_4 = arith.constant 0.353553385 : f32
    %5 = vector.broadcast %cst_4 : f32 to vector<8x128xf32>
    %6 = arith.mulf %4, %5 : vector<8x128xf32>
    %7 = vector.extract_strided_slice %3 {offsets = [8, 0], sizes = [8, 128], strides = [1, 1]} : vector<24x128xf32> to vector<8x128xf32>
    %8 = vector.extract_strided_slice %3 {offsets = [16, 0], sizes = [8, 128], strides = [1, 1]} : vector<24x128xf32> to vector<8x128xf32>
    %c1 = arith.constant 1 : index
    %c0_5 = arith.constant 0 : index
    %c0_6 = arith.constant 0 : index
    %9 = vector.load %arg1[%c1, %c0_5, %c0_6] : memref<8x32x128xf32, #tpu.memory_space<vmem>>, vector<1x32x128xf32>
    %10 = vector.shape_cast %9 : vector<1x32x128xf32> to vector<32x128xf32>
    %cst_7 = arith.constant dense<0.000000e+00> : vector<24x128xf32>
    %11 = tpu.matmul %0, %10, %cst_7 {dimension_numbers = #tpu.dot_dimension_numbers<[1], [0], [0], [1], [0, 0, 1, 1], [], []>} : vector<24x32xf32>, vector<32x128xf32>, vector<24x128xf32> -> vector<24x128xf32>
    %12 = vector.extract_strided_slice %11 {offsets = [0, 0], sizes = [8, 128], strides = [1, 1]} : vector<24x128xf32> to vector<8x128xf32>
    %cst_8 = arith.constant 0.353553385 : f32
    %13 = vector.broadcast %cst_8 : f32 to vector<8x128xf32>
    %14 = arith.mulf %12, %13 : vector<8x128xf32>
    %15 = vector.extract_strided_slice %11 {offsets = [8, 0], sizes = [8, 128], strides = [1, 1]} : vector<24x128xf32> to vector<8x128xf32>
    %16 = vector.extract_strided_slice %11 {offsets = [16, 0], sizes = [8, 128], strides = [1, 1]} : vector<24x128xf32> to vector<8x128xf32>
    %c2 = arith.constant 2 : index
    %c0_9 = arith.constant 0 : index
    %c0_10 = arith.constant 0 : index
    %17 = vector.load %arg1[%c2, %c0_9, %c0_10] : memref<8x32x128xf32, #tpu.memory_space<vmem>>, vector<1x32x128xf32>
    %18 = vector.shape_cast %17 : vector<1x32x128xf32> to vector<32x128xf32>
    %cst_11 = arith.constant dense<0.000000e+00> : vector<24x128xf32>
    %19 = tpu.matmul %0, %18, %cst_11 {dimension_numbers = #tpu.dot_dimension_numbers<[1], [0], [0], [1], [0, 0, 1, 1], [], []>} : vector<24x32xf32>, vector<32x128xf32>, vector<24x128xf32> -> vector<24x128xf32>
    %20 = vector.extract_strided_slice %19 {offsets = [0, 0], sizes = [8, 128], strides = [1, 1]} : vector<24x128xf32> to vector<8x128xf32>
    %cst_12 = arith.constant 0.353553385 : f32
    %21 = vector.broadcast %cst_12 : f32 to vector<8x128xf32>
    %22 = arith.mulf %20, %21 : vector<8x128xf32>
    %23 = vector.extract_strided_slice %19 {offsets = [8, 0], sizes = [8, 128], strides = [1, 1]} : vector<24x128xf32> to vector<8x128xf32>
    %24 = vector.extract_strided_slice %19 {offsets = [16, 0], sizes = [8, 128], strides = [1, 1]} : vector<24x128xf32> to vector<8x128xf32>
    %c3 = arith.constant 3 : index
    %c0_13 = arith.constant 0 : index
    %c0_14 = arith.constant 0 : index
    %25 = vector.load %arg1[%c3, %c0_13, %c0_14] : memref<8x32x128xf32, #tpu.memory_space<vmem>>, vector<1x32x128xf32>
    %26 = vector.shape_cast %25 : vector<1x32x128xf32> to vector<32x128xf32>
    %cst_15 = arith.constant dense<0.000000e+00> : vector<24x128xf32>
    %27 = tpu.matmul %0, %26, %cst_15 {dimension_numbers = #tpu.dot_dimension_numbers<[1], [0], [0], [1], [0, 0, 1, 1], [], []>} : vector<24x32xf32>, vector<32x128xf32>, vector<24x128xf32> -> vector<24x128xf32>
    %28 = vector.extract_strided_slice %27 {offsets = [0, 0], sizes = [8, 128], strides = [1, 1]} : vector<24x128xf32> to vector<8x128xf32>
    %cst_16 = arith.constant 0.353553385 : f32
    %29 = vector.broadcast %cst_16 : f32 to vector<8x128xf32>
    %30 = arith.mulf %28, %29 : vector<8x128xf32>
    %31 = vector.extract_strided_slice %27 {offsets = [8, 0], sizes = [8, 128], strides = [1, 1]} : vector<24x128xf32> to vector<8x128xf32>
    %32 = vector.extract_strided_slice %27 {offsets = [16, 0], sizes = [8, 128], strides = [1, 1]} : vector<24x128xf32> to vector<8x128xf32>
    %c4 = arith.constant 4 : index
    %c0_17 = arith.constant 0 : index
    %c0_18 = arith.constant 0 : index
    %33 = vector.load %arg1[%c4, %c0_17, %c0_18] : memref<8x32x128xf32, #tpu.memory_space<vmem>>, vector<1x32x128xf32>
    %34 = vector.shape_cast %33 : vector<1x32x128xf32> to vector<32x128xf32>
    %cst_19 = arith.constant dense<0.000000e+00> : vector<24x128xf32>
    %35 = tpu.matmul %0, %34, %cst_19 {dimension_numbers = #tpu.dot_dimension_numbers<[1], [0], [0], [1], [0, 0, 1, 1], [], []>} : vector<24x32xf32>, vector<32x128xf32>, vector<24x128xf32> -> vector<24x128xf32>
    %36 = vector.extract_strided_slice %35 {offsets = [0, 0], sizes = [8, 128], strides = [1, 1]} : vector<24x128xf32> to vector<8x128xf32>
    %cst_20 = arith.constant 0.353553385 : f32
    %37 = vector.broadcast %cst_20 : f32 to vector<8x128xf32>
    %38 = arith.mulf %36, %37 : vector<8x128xf32>
    %39 = vector.extract_strided_slice %35 {offsets = [8, 0], sizes = [8, 128], strides = [1, 1]} : vector<24x128xf32> to vector<8x128xf32>
    %40 = vector.extract_strided_slice %35 {offsets = [16, 0], sizes = [8, 128], strides = [1, 1]} : vector<24x128xf32> to vector<8x128xf32>
    %c5 = arith.constant 5 : index
    %c0_21 = arith.constant 0 : index
    %c0_22 = arith.constant 0 : index
    %41 = vector.load %arg1[%c5, %c0_21, %c0_22] : memref<8x32x128xf32, #tpu.memory_space<vmem>>, vector<1x32x128xf32>
    %42 = vector.shape_cast %41 : vector<1x32x128xf32> to vector<32x128xf32>
    %cst_23 = arith.constant dense<0.000000e+00> : vector<24x128xf32>
    %43 = tpu.matmul %0, %42, %cst_23 {dimension_numbers = #tpu.dot_dimension_numbers<[1], [0], [0], [1], [0, 0, 1, 1], [], []>} : vector<24x32xf32>, vector<32x128xf32>, vector<24x128xf32> -> vector<24x128xf32>
    %44 = vector.extract_strided_slice %43 {offsets = [0, 0], sizes = [8, 128], strides = [1, 1]} : vector<24x128xf32> to vector<8x128xf32>
    %cst_24 = arith.constant 0.353553385 : f32
    %45 = vector.broadcast %cst_24 : f32 to vector<8x128xf32>
    %46 = arith.mulf %44, %45 : vector<8x128xf32>
    %47 = vector.extract_strided_slice %43 {offsets = [8, 0], sizes = [8, 128], strides = [1, 1]} : vector<24x128xf32> to vector<8x128xf32>
    %48 = vector.extract_strided_slice %43 {offsets = [16, 0], sizes = [8, 128], strides = [1, 1]} : vector<24x128xf32> to vector<8x128xf32>
    %c6 = arith.constant 6 : index
    %c0_25 = arith.constant 0 : index
    %c0_26 = arith.constant 0 : index
    %49 = vector.load %arg1[%c6, %c0_25, %c0_26] : memref<8x32x128xf32, #tpu.memory_space<vmem>>, vector<1x32x128xf32>
    %50 = vector.shape_cast %49 : vector<1x32x128xf32> to vector<32x128xf32>
    %cst_27 = arith.constant dense<0.000000e+00> : vector<24x128xf32>
    %51 = tpu.matmul %0, %50, %cst_27 {dimension_numbers = #tpu.dot_dimension_numbers<[1], [0], [0], [1], [0, 0, 1, 1], [], []>} : vector<24x32xf32>, vector<32x128xf32>, vector<24x128xf32> -> vector<24x128xf32>
    %52 = vector.extract_strided_slice %51 {offsets = [0, 0], sizes = [8, 128], strides = [1, 1]} : vector<24x128xf32> to vector<8x128xf32>
    %cst_28 = arith.constant 0.353553385 : f32
    %53 = vector.broadcast %cst_28 : f32 to vector<8x128xf32>
    %54 = arith.mulf %52, %53 : vector<8x128xf32>
    %55 = vector.extract_strided_slice %51 {offsets = [8, 0], sizes = [8, 128], strides = [1, 1]} : vector<24x128xf32> to vector<8x128xf32>
    %56 = vector.extract_strided_slice %51 {offsets = [16, 0], sizes = [8, 128], strides = [1, 1]} : vector<24x128xf32> to vector<8x128xf32>
    %c7 = arith.constant 7 : index
    %c0_29 = arith.constant 0 : index
    %c0_30 = arith.constant 0 : index
    %57 = vector.load %arg1[%c7, %c0_29, %c0_30] : memref<8x32x128xf32, #tpu.memory_space<vmem>>, vector<1x32x128xf32>
    %58 = vector.shape_cast %57 : vector<1x32x128xf32> to vector<32x128xf32>
    %cst_31 = arith.constant dense<0.000000e+00> : vector<24x128xf32>
    %59 = tpu.matmul %0, %58, %cst_31 {dimension_numbers = #tpu.dot_dimension_numbers<[1], [0], [0], [1], [0, 0, 1, 1], [], []>} : vector<24x32xf32>, vector<32x128xf32>, vector<24x128xf32> -> vector<24x128xf32>
    %60 = vector.extract_strided_slice %59 {offsets = [0, 0], sizes = [8, 128], strides = [1, 1]} : vector<24x128xf32> to vector<8x128xf32>
    %cst_32 = arith.constant 0.353553385 : f32
    %61 = vector.broadcast %cst_32 : f32 to vector<8x128xf32>
    %62 = arith.mulf %60, %61 : vector<8x128xf32>
    %63 = vector.extract_strided_slice %59 {offsets = [8, 0], sizes = [8, 128], strides = [1, 1]} : vector<24x128xf32> to vector<8x128xf32>
    %64 = vector.extract_strided_slice %59 {offsets = [16, 0], sizes = [8, 128], strides = [1, 1]} : vector<24x128xf32> to vector<8x128xf32>
    %65 = vector.extract_strided_slice %7 {offsets = [0, 0], sizes = [1, 128], strides = [1, 1]} : vector<8x128xf32> to vector<1x128xf32>
    %66 = vector.extract_strided_slice %15 {offsets = [0, 0], sizes = [1, 128], strides = [1, 1]} : vector<8x128xf32> to vector<1x128xf32>
    %67 = vector.extract_strided_slice %23 {offsets = [0, 0], sizes = [1, 128], strides = [1, 1]} : vector<8x128xf32> to vector<1x128xf32>
    %68 = vector.extract_strided_slice %31 {offsets = [0, 0], sizes = [1, 128], strides = [1, 1]} : vector<8x128xf32> to vector<1x128xf32>
    %69 = vector.extract_strided_slice %39 {offsets = [0, 0], sizes = [1, 128], strides = [1, 1]} : vector<8x128xf32> to vector<1x128xf32>
    %70 = vector.extract_strided_slice %47 {offsets = [0, 0], sizes = [1, 128], strides = [1, 1]} : vector<8x128xf32> to vector<1x128xf32>
    %71 = vector.extract_strided_slice %55 {offsets = [0, 0], sizes = [1, 128], strides = [1, 1]} : vector<8x128xf32> to vector<1x128xf32>
    %72 = vector.extract_strided_slice %63 {offsets = [0, 0], sizes = [1, 128], strides = [1, 1]} : vector<8x128xf32> to vector<1x128xf32>
    %73 = tpu.concatenate %65, %66, %67, %68, %69, %70, %71, %72 in 0 : vector<1x128xf32>, vector<1x128xf32>, vector<1x128xf32>, vector<1x128xf32>, vector<1x128xf32>, vector<1x128xf32>, vector<1x128xf32>, vector<1x128xf32> -> vector<8x128xf32>
    %74 = vector.extract_strided_slice %7 {offsets = [1, 0], sizes = [1, 128], strides = [1, 1]} : vector<8x128xf32> to vector<1x128xf32>
    %75 = vector.extract_strided_slice %15 {offsets = [1, 0], sizes = [1, 128], strides = [1, 1]} : vector<8x128xf32> to vector<1x128xf32>
    %76 = vector.extract_strided_slice %23 {offsets = [1, 0], sizes = [1, 128], strides = [1, 1]} : vector<8x128xf32> to vector<1x128xf32>
    %77 = vector.extract_strided_slice %31 {offsets = [1, 0], sizes = [1, 128], strides = [1, 1]} : vector<8x128xf32> to vector<1x128xf32>
    %78 = vector.extract_strided_slice %39 {offsets = [1, 0], sizes = [1, 128], strides = [1, 1]} : vector<8x128xf32> to vector<1x128xf32>
    %79 = vector.extract_strided_slice %47 {offsets = [1, 0], sizes = [1, 128], strides = [1, 1]} : vector<8x128xf32> to vector<1x128xf32>
    %80 = vector.extract_strided_slice %55 {offsets = [1, 0], sizes = [1, 128], strides = [1, 1]} : vector<8x128xf32> to vector<1x128xf32>
    %81 = vector.extract_strided_slice %63 {offsets = [1, 0], sizes = [1, 128], strides = [1, 1]} : vector<8x128xf32> to vector<1x128xf32>
    %82 = tpu.concatenate %74, %75, %76, %77, %78, %79, %80, %81 in 0 : vector<1x128xf32>, vector<1x128xf32>, vector<1x128xf32>, vector<1x128xf32>, vector<1x128xf32>, vector<1x128xf32>, vector<1x128xf32>, vector<1x128xf32> -> vector<8x128xf32>
    %83 = vector.extract_strided_slice %7 {offsets = [2, 0], sizes = [1, 128], strides = [1, 1]} : vector<8x128xf32> to vector<1x128xf32>
    %84 = vector.extract_strided_slice %15 {offsets = [2, 0], sizes = [1, 128], strides = [1, 1]} : vector<8x128xf32> to vector<1x128xf32>
    %85 = vector.extract_strided_slice %23 {offsets = [2, 0], sizes = [1, 128], strides = [1, 1]} : vector<8x128xf32> to vector<1x128xf32>
    %86 = vector.extract_strided_slice %31 {offsets = [2, 0], sizes = [1, 128], strides = [1, 1]} : vector<8x128xf32> to vector<1x128xf32>
    %87 = vector.extract_strided_slice %39 {offsets = [2, 0], sizes = [1, 128], strides = [1, 1]} : vector<8x128xf32> to vector<1x128xf32>
    %88 = vector.extract_strided_slice %47 {offsets = [2, 0], sizes = [1, 128], strides = [1, 1]} : vector<8x128xf32> to vector<1x128xf32>
    %89 = vector.extract_strided_slice %55 {offsets = [2, 0], sizes = [1, 128], strides = [1, 1]} : vector<8x128xf32> to vector<1x128xf32>
    %90 = vector.extract_strided_slice %63 {offsets = [2, 0], sizes = [1, 128], strides = [1, 1]} : vector<8x128xf32> to vector<1x128xf32>
    %91 = tpu.concatenate %83, %84, %85, %86, %87, %88, %89, %90 in 0 : vector<1x128xf32>, vector<1x128xf32>, vector<1x128xf32>, vector<1x128xf32>, vector<1x128xf32>, vector<1x128xf32>, vector<1x128xf32>, vector<1x128xf32> -> vector<8x128xf32>
    %92 = vector.extract_strided_slice %7 {offsets = [3, 0], sizes = [1, 128], strides = [1, 1]} : vector<8x128xf32> to vector<1x128xf32>
    %93 = vector.extract_strided_slice %15 {offsets = [3, 0], sizes = [1, 128], strides = [1, 1]} : vector<8x128xf32> to vector<1x128xf32>
    %94 = vector.extract_strided_slice %23 {offsets = [3, 0], sizes = [1, 128], strides = [1, 1]} : vector<8x128xf32> to vector<1x128xf32>
    %95 = vector.extract_strided_slice %31 {offsets = [3, 0], sizes = [1, 128], strides = [1, 1]} : vector<8x128xf32> to vector<1x128xf32>
    %96 = vector.extract_strided_slice %39 {offsets = [3, 0], sizes = [1, 128], strides = [1, 1]} : vector<8x128xf32> to vector<1x128xf32>
    %97 = vector.extract_strided_slice %47 {offsets = [3, 0], sizes = [1, 128], strides = [1, 1]} : vector<8x128xf32> to vector<1x128xf32>
    %98 = vector.extract_strided_slice %55 {offsets = [3, 0], sizes = [1, 128], strides = [1, 1]} : vector<8x128xf32> to vector<1x128xf32>
    %99 = vector.extract_strided_slice %63 {offsets = [3, 0], sizes = [1, 128], strides = [1, 1]} : vector<8x128xf32> to vector<1x128xf32>
    %100 = tpu.concatenate %92, %93, %94, %95, %96, %97, %98, %99 in 0 : vector<1x128xf32>, vector<1x128xf32>, vector<1x128xf32>, vector<1x128xf32>, vector<1x128xf32>, vector<1x128xf32>, vector<1x128xf32>, vector<1x128xf32> -> vector<8x128xf32>
    %101 = vector.extract_strided_slice %7 {offsets = [4, 0], sizes = [1, 128], strides = [1, 1]} : vector<8x128xf32> to vector<1x128xf32>
    %102 = vector.extract_strided_slice %15 {offsets = [4, 0], sizes = [1, 128], strides = [1, 1]} : vector<8x128xf32> to vector<1x128xf32>
    %103 = vector.extract_strided_slice %23 {offsets = [4, 0], sizes = [1, 128], strides = [1, 1]} : vector<8x128xf32> to vector<1x128xf32>
    %104 = vector.extract_strided_slice %31 {offsets = [4, 0], sizes = [1, 128], strides = [1, 1]} : vector<8x128xf32> to vector<1x128xf32>
    %105 = vector.extract_strided_slice %39 {offsets = [4, 0], sizes = [1, 128], strides = [1, 1]} : vector<8x128xf32> to vector<1x128xf32>
    %106 = vector.extract_strided_slice %47 {offsets = [4, 0], sizes = [1, 128], strides = [1, 1]} : vector<8x128xf32> to vector<1x128xf32>
    %107 = vector.extract_strided_slice %55 {offsets = [4, 0], sizes = [1, 128], strides = [1, 1]} : vector<8x128xf32> to vector<1x128xf32>
    %108 = vector.extract_strided_slice %63 {offsets = [4, 0], sizes = [1, 128], strides = [1, 1]} : vector<8x128xf32> to vector<1x128xf32>
    %109 = tpu.concatenate %101, %102, %103, %104, %105, %106, %107, %108 in 0 : vector<1x128xf32>, vector<1x128xf32>, vector<1x128xf32>, vector<1x128xf32>, vector<1x128xf32>, vector<1x128xf32>, vector<1x128xf32>, vector<1x128xf32> -> vector<8x128xf32>
    %110 = vector.extract_strided_slice %7 {offsets = [5, 0], sizes = [1, 128], strides = [1, 1]} : vector<8x128xf32> to vector<1x128xf32>
    %111 = vector.extract_strided_slice %15 {offsets = [5, 0], sizes = [1, 128], strides = [1, 1]} : vector<8x128xf32> to vector<1x128xf32>
    %112 = vector.extract_strided_slice %23 {offsets = [5, 0], sizes = [1, 128], strides = [1, 1]} : vector<8x128xf32> to vector<1x128xf32>
    %113 = vector.extract_strided_slice %31 {offsets = [5, 0], sizes = [1, 128], strides = [1, 1]} : vector<8x128xf32> to vector<1x128xf32>
    %114 = vector.extract_strided_slice %39 {offsets = [5, 0], sizes = [1, 128], strides = [1, 1]} : vector<8x128xf32> to vector<1x128xf32>
    %115 = vector.extract_strided_slice %47 {offsets = [5, 0], sizes = [1, 128], strides = [1, 1]} : vector<8x128xf32> to vector<1x128xf32>
    %116 = vector.extract_strided_slice %55 {offsets = [5, 0], sizes = [1, 128], strides = [1, 1]} : vector<8x128xf32> to vector<1x128xf32>
    %117 = vector.extract_strided_slice %63 {offsets = [5, 0], sizes = [1, 128], strides = [1, 1]} : vector<8x128xf32> to vector<1x128xf32>
    %118 = tpu.concatenate %110, %111, %112, %113, %114, %115, %116, %117 in 0 : vector<1x128xf32>, vector<1x128xf32>, vector<1x128xf32>, vector<1x128xf32>, vector<1x128xf32>, vector<1x128xf32>, vector<1x128xf32>, vector<1x128xf32> -> vector<8x128xf32>
    %119 = vector.extract_strided_slice %7 {offsets = [6, 0], sizes = [1, 128], strides = [1, 1]} : vector<8x128xf32> to vector<1x128xf32>
    %120 = vector.extract_strided_slice %15 {offsets = [6, 0], sizes = [1, 128], strides = [1, 1]} : vector<8x128xf32> to vector<1x128xf32>
    %121 = vector.extract_strided_slice %23 {offsets = [6, 0], sizes = [1, 128], strides = [1, 1]} : vector<8x128xf32> to vector<1x128xf32>
    %122 = vector.extract_strided_slice %31 {offsets = [6, 0], sizes = [1, 128], strides = [1, 1]} : vector<8x128xf32> to vector<1x128xf32>
    %123 = vector.extract_strided_slice %39 {offsets = [6, 0], sizes = [1, 128], strides = [1, 1]} : vector<8x128xf32> to vector<1x128xf32>
    %124 = vector.extract_strided_slice %47 {offsets = [6, 0], sizes = [1, 128], strides = [1, 1]} : vector<8x128xf32> to vector<1x128xf32>
    %125 = vector.extract_strided_slice %55 {offsets = [6, 0], sizes = [1, 128], strides = [1, 1]} : vector<8x128xf32> to vector<1x128xf32>
    %126 = vector.extract_strided_slice %63 {offsets = [6, 0], sizes = [1, 128], strides = [1, 1]} : vector<8x128xf32> to vector<1x128xf32>
    %127 = tpu.concatenate %119, %120, %121, %122, %123, %124, %125, %126 in 0 : vector<1x128xf32>, vector<1x128xf32>, vector<1x128xf32>, vector<1x128xf32>, vector<1x128xf32>, vector<1x128xf32>, vector<1x128xf32>, vector<1x128xf32> -> vector<8x128xf32>
    %128 = vector.extract_strided_slice %7 {offsets = [7, 0], sizes = [1, 128], strides = [1, 1]} : vector<8x128xf32> to vector<1x128xf32>
    %129 = vector.extract_strided_slice %15 {offsets = [7, 0], sizes = [1, 128], strides = [1, 1]} : vector<8x128xf32> to vector<1x128xf32>
    %130 = vector.extract_strided_slice %23 {offsets = [7, 0], sizes = [1, 128], strides = [1, 1]} : vector<8x128xf32> to vector<1x128xf32>
    %131 = vector.extract_strided_slice %31 {offsets = [7, 0], sizes = [1, 128], strides = [1, 1]} : vector<8x128xf32> to vector<1x128xf32>
    %132 = vector.extract_strided_slice %39 {offsets = [7, 0], sizes = [1, 128], strides = [1, 1]} : vector<8x128xf32> to vector<1x128xf32>
    %133 = vector.extract_strided_slice %47 {offsets = [7, 0], sizes = [1, 128], strides = [1, 1]} : vector<8x128xf32> to vector<1x128xf32>
    %134 = vector.extract_strided_slice %55 {offsets = [7, 0], sizes = [1, 128], strides = [1, 1]} : vector<8x128xf32> to vector<1x128xf32>
    %135 = vector.extract_strided_slice %63 {offsets = [7, 0], sizes = [1, 128], strides = [1, 1]} : vector<8x128xf32> to vector<1x128xf32>
    %136 = tpu.concatenate %128, %129, %130, %131, %132, %133, %134, %135 in 0 : vector<1x128xf32>, vector<1x128xf32>, vector<1x128xf32>, vector<1x128xf32>, vector<1x128xf32>, vector<1x128xf32>, vector<1x128xf32>, vector<1x128xf32> -> vector<8x128xf32>
    %137 = tpu.iota {dimensions = array<i32: 0>} : vector<8x128xi32>
    %138 = vector.extract_strided_slice %6 {offsets = [0, 0], sizes = [1, 128], strides = [1, 1]} : vector<8x128xf32> to vector<1x128xf32>
    %139 = vector.broadcast %138 : vector<1x128xf32> to vector<8x128xf32>
    %140 = arith.mulf %73, %139 : vector<8x128xf32>
    %141 = vector.extract_strided_slice %6 {offsets = [1, 0], sizes = [1, 128], strides = [1, 1]} : vector<8x128xf32> to vector<1x128xf32>
    %142 = vector.broadcast %141 : vector<1x128xf32> to vector<8x128xf32>
    %143 = arith.mulf %82, %142 : vector<8x128xf32>
    %144 = arith.addf %140, %143 : vector<8x128xf32>
    %145 = vector.extract_strided_slice %6 {offsets = [2, 0], sizes = [1, 128], strides = [1, 1]} : vector<8x128xf32> to vector<1x128xf32>
    %146 = vector.broadcast %145 : vector<1x128xf32> to vector<8x128xf32>
    %147 = arith.mulf %91, %146 : vector<8x128xf32>
    %148 = arith.addf %144, %147 : vector<8x128xf32>
    %149 = vector.extract_strided_slice %6 {offsets = [3, 0], sizes = [1, 128], strides = [1, 1]} : vector<8x128xf32> to vector<1x128xf32>
    %150 = vector.broadcast %149 : vector<1x128xf32> to vector<8x128xf32>
    %151 = arith.mulf %100, %150 : vector<8x128xf32>
    %152 = arith.addf %148, %151 : vector<8x128xf32>
    %153 = vector.extract_strided_slice %6 {offsets = [4, 0], sizes = [1, 128], strides = [1, 1]} : vector<8x128xf32> to vector<1x128xf32>
    %154 = vector.broadcast %153 : vector<1x128xf32> to vector<8x128xf32>
    %155 = arith.mulf %109, %154 : vector<8x128xf32>
    %156 = arith.addf %152, %155 : vector<8x128xf32>
    %157 = vector.extract_strided_slice %6 {offsets = [5, 0], sizes = [1, 128], strides = [1, 1]} : vector<8x128xf32> to vector<1x128xf32>
    %158 = vector.broadcast %157 : vector<1x128xf32> to vector<8x128xf32>
    %159 = arith.mulf %118, %158 : vector<8x128xf32>
    %160 = arith.addf %156, %159 : vector<8x128xf32>
    %161 = vector.extract_strided_slice %6 {offsets = [6, 0], sizes = [1, 128], strides = [1, 1]} : vector<8x128xf32> to vector<1x128xf32>
    %162 = vector.broadcast %161 : vector<1x128xf32> to vector<8x128xf32>
    %163 = arith.mulf %127, %162 : vector<8x128xf32>
    %164 = arith.addf %160, %163 : vector<8x128xf32>
    %165 = vector.extract_strided_slice %6 {offsets = [7, 0], sizes = [1, 128], strides = [1, 1]} : vector<8x128xf32> to vector<1x128xf32>
    %166 = vector.broadcast %165 : vector<1x128xf32> to vector<8x128xf32>
    %167 = arith.mulf %136, %166 : vector<8x128xf32>
    %168 = arith.addf %164, %167 : vector<8x128xf32>
    %c0_i32 = arith.constant 0 : i32
    %169 = vector.broadcast %c0_i32 : i32 to vector<8x128xi32>
    %170 = arith.cmpi sle, %137, %169 : vector<8x128xi32>
    %cst_33 = arith.constant -1.000000e+30 : f32
    %171 = vector.broadcast %cst_33 : f32 to vector<8x128xf32>
    %172 = arith.select %170, %168, %171 : vector<8x128xi1>, vector<8x128xf32>
    %cst_34 = arith.constant dense<0xFF800000> : vector<128xf32>
    %173 = vector.multi_reduction <maximumf>, %172, %cst_34 [0] : vector<8x128xf32> to vector<128xf32>
    %174 = vector.shape_cast %173 : vector<128xf32> to vector<1x128xf32>
    %175 = vector.broadcast %174 : vector<1x128xf32> to vector<8x128xf32>
    %176 = arith.subf %172, %175 : vector<8x128xf32>
    %177 = math.exp %176 : vector<8x128xf32>
    %cst_35 = arith.constant dense<0.000000e+00> : vector<128xf32>
    %178 = vector.multi_reduction <add>, %177, %cst_35 [0] : vector<8x128xf32> to vector<128xf32>
    %179 = vector.shape_cast %178 : vector<128xf32> to vector<1x128xf32>
    %180 = tpu.reciprocal %179 {approx = true} : vector<1x128xf32> -> vector<1x128xf32>
    %181 = vector.broadcast %180 : vector<1x128xf32> to vector<8x128xf32>
    %182 = arith.mulf %177, %181 : vector<8x128xf32>
    %183 = vector.extract_strided_slice %182 {offsets = [0, 0], sizes = [1, 128], strides = [1, 1]} : vector<8x128xf32> to vector<1x128xf32>
    %184 = vector.broadcast %183 : vector<1x128xf32> to vector<8x128xf32>
    %185 = arith.mulf %184, %8 : vector<8x128xf32>
    %c0_36 = arith.constant 0 : index
    %c0_37 = arith.constant 0 : index
    %c0_38 = arith.constant 0 : index
    %186 = vector.load %arg3[%c0_36, %c0_37, %c0_38] : memref<8x8x128xf32, #tpu.memory_space<vmem>>, vector<1x8x128xf32>
    %187 = vector.shape_cast %186 : vector<1x8x128xf32> to vector<8x128xf32>
    %188 = vector.shape_cast %185 : vector<8x128xf32> to vector<1x8x128xf32>
    tpu.vector_store %arg3[%c0_36, %c0_37, %c0_38], %188 {strides = array<i32>} : memref<8x8x128xf32, #tpu.memory_space<vmem>>, vector<1x8x128xf32>,
    %189 = vector.extract_strided_slice %14 {offsets = [0, 0], sizes = [1, 128], strides = [1, 1]} : vector<8x128xf32> to vector<1x128xf32>
    %190 = vector.broadcast %189 : vector<1x128xf32> to vector<8x128xf32>
    %191 = arith.mulf %73, %190 : vector<8x128xf32>
    %192 = vector.extract_strided_slice %14 {offsets = [1, 0], sizes = [1, 128], strides = [1, 1]} : vector<8x128xf32> to vector<1x128xf32>
    %193 = vector.broadcast %192 : vector<1x128xf32> to vector<8x128xf32>
    %194 = arith.mulf %82, %193 : vector<8x128xf32>
    %195 = arith.addf %191, %194 : vector<8x128xf32>
    %196 = vector.extract_strided_slice %14 {offsets = [2, 0], sizes = [1, 128], strides = [1, 1]} : vector<8x128xf32> to vector<1x128xf32>
    %197 = vector.broadcast %196 : vector<1x128xf32> to vector<8x128xf32>
    %198 = arith.mulf %91, %197 : vector<8x128xf32>
    %199 = arith.addf %195, %198 : vector<8x128xf32>
    %200 = vector.extract_strided_slice %14 {offsets = [3, 0], sizes = [1, 128], strides = [1, 1]} : vector<8x128xf32> to vector<1x128xf32>
    %201 = vector.broadcast %200 : vector<1x128xf32> to vector<8x128xf32>
    %202 = arith.mulf %100, %201 : vector<8x128xf32>
    %203 = arith.addf %199, %202 : vector<8x128xf32>
    %204 = vector.extract_strided_slice %14 {offsets = [4, 0], sizes = [1, 128], strides = [1, 1]} : vector<8x128xf32> to vector<1x128xf32>
    %205 = vector.broadcast %204 : vector<1x128xf32> to vector<8x128xf32>
    %206 = arith.mulf %109, %205 : vector<8x128xf32>
    %207 = arith.addf %203, %206 : vector<8x128xf32>
    %208 = vector.extract_strided_slice %14 {offsets = [5, 0], sizes = [1, 128], strides = [1, 1]} : vector<8x128xf32> to vector<1x128xf32>
    %209 = vector.broadcast %208 : vector<1x128xf32> to vector<8x128xf32>
    %210 = arith.mulf %118, %209 : vector<8x128xf32>
    %211 = arith.addf %207, %210 : vector<8x128xf32>
    %212 = vector.extract_strided_slice %14 {offsets = [6, 0], sizes = [1, 128], strides = [1, 1]} : vector<8x128xf32> to vector<1x128xf32>
    %213 = vector.broadcast %212 : vector<1x128xf32> to vector<8x128xf32>
    %214 = arith.mulf %127, %213 : vector<8x128xf32>
    %215 = arith.addf %211, %214 : vector<8x128xf32>
    %216 = vector.extract_strided_slice %14 {offsets = [7, 0], sizes = [1, 128], strides = [1, 1]} : vector<8x128xf32> to vector<1x128xf32>
    %217 = vector.broadcast %216 : vector<1x128xf32> to vector<8x128xf32>
    %218 = arith.mulf %136, %217 : vector<8x128xf32>
    %219 = arith.addf %215, %218 : vector<8x128xf32>
    %c1_i32 = arith.constant 1 : i32
    %220 = vector.broadcast %c1_i32 : i32 to vector<8x128xi32>
    %221 = arith.cmpi sle, %137, %220 : vector<8x128xi32>
    %cst_39 = arith.constant -1.000000e+30 : f32
    %222 = vector.broadcast %cst_39 : f32 to vector<8x128xf32>
    %223 = arith.select %221, %219, %222 : vector<8x128xi1>, vector<8x128xf32>
    %cst_40 = arith.constant dense<0xFF800000> : vector<128xf32>
    %224 = vector.multi_reduction <maximumf>, %223, %cst_40 [0] : vector<8x128xf32> to vector<128xf32>
    %225 = vector.shape_cast %224 : vector<128xf32> to vector<1x128xf32>
    %226 = vector.broadcast %225 : vector<1x128xf32> to vector<8x128xf32>
    %227 = arith.subf %223, %226 : vector<8x128xf32>
    %228 = math.exp %227 : vector<8x128xf32>
    %cst_41 = arith.constant dense<0.000000e+00> : vector<128xf32>
    %229 = vector.multi_reduction <add>, %228, %cst_41 [0] : vector<8x128xf32> to vector<128xf32>
    %230 = vector.shape_cast %229 : vector<128xf32> to vector<1x128xf32>
    %231 = tpu.reciprocal %230 {approx = true} : vector<1x128xf32> -> vector<1x128xf32>
    %232 = vector.broadcast %231 : vector<1x128xf32> to vector<8x128xf32>
    %233 = arith.mulf %228, %232 : vector<8x128xf32>
    %234 = vector.extract_strided_slice %233 {offsets = [0, 0], sizes = [1, 128], strides = [1, 1]} : vector<8x128xf32> to vector<1x128xf32>
    %235 = vector.broadcast %234 : vector<1x128xf32> to vector<8x128xf32>
    %236 = arith.mulf %235, %8 : vector<8x128xf32>
    %237 = vector.extract_strided_slice %233 {offsets = [1, 0], sizes = [1, 128], strides = [1, 1]} : vector<8x128xf32> to vector<1x128xf32>
    %238 = vector.broadcast %237 : vector<1x128xf32> to vector<8x128xf32>
    %239 = arith.mulf %238, %16 : vector<8x128xf32>
    %240 = arith.addf %236, %239 : vector<8x128xf32>
    %c1_42 = arith.constant 1 : index
    %c0_43 = arith.constant 0 : index
    %c0_44 = arith.constant 0 : index
    %241 = vector.load %arg3[%c1_42, %c0_43, %c0_44] : memref<8x8x128xf32, #tpu.memory_space<vmem>>, vector<1x8x128xf32>
    %242 = vector.shape_cast %241 : vector<1x8x128xf32> to vector<8x128xf32>
    %243 = vector.shape_cast %240 : vector<8x128xf32> to vector<1x8x128xf32>
    tpu.vector_store %arg3[%c1_42, %c0_43, %c0_44], %243 {strides = array<i32>} : memref<8x8x128xf32, #tpu.memory_space<vmem>>, vector<1x8x128xf32>,
    %244 = vector.extract_strided_slice %22 {offsets = [0, 0], sizes = [1, 128], strides = [1, 1]} : vector<8x128xf32> to vector<1x128xf32>
    %245 = vector.broadcast %244 : vector<1x128xf32> to vector<8x128xf32>
    %246 = arith.mulf %73, %245 : vector<8x128xf32>
    %247 = vector.extract_strided_slice %22 {offsets = [1, 0], sizes = [1, 128], strides = [1, 1]} : vector<8x128xf32> to vector<1x128xf32>
    %248 = vector.broadcast %247 : vector<1x128xf32> to vector<8x128xf32>
    %249 = arith.mulf %82, %248 : vector<8x128xf32>
    %250 = arith.addf %246, %249 : vector<8x128xf32>
    %251 = vector.extract_strided_slice %22 {offsets = [2, 0], sizes = [1, 128], strides = [1, 1]} : vector<8x128xf32> to vector<1x128xf32>
    %252 = vector.broadcast %251 : vector<1x128xf32> to vector<8x128xf32>
    %253 = arith.mulf %91, %252 : vector<8x128xf32>
    %254 = arith.addf %250, %253 : vector<8x128xf32>
    %255 = vector.extract_strided_slice %22 {offsets = [3, 0], sizes = [1, 128], strides = [1, 1]} : vector<8x128xf32> to vector<1x128xf32>
    %256 = vector.broadcast %255 : vector<1x128xf32> to vector<8x128xf32>
    %257 = arith.mulf %100, %256 : vector<8x128xf32>
    %258 = arith.addf %254, %257 : vector<8x128xf32>
    %259 = vector.extract_strided_slice %22 {offsets = [4, 0], sizes = [1, 128], strides = [1, 1]} : vector<8x128xf32> to vector<1x128xf32>
    %260 = vector.broadcast %259 : vector<1x128xf32> to vector<8x128xf32>
    %261 = arith.mulf %109, %260 : vector<8x128xf32>
    %262 = arith.addf %258, %261 : vector<8x128xf32>
    %263 = vector.extract_strided_slice %22 {offsets = [5, 0], sizes = [1, 128], strides = [1, 1]} : vector<8x128xf32> to vector<1x128xf32>
    %264 = vector.broadcast %263 : vector<1x128xf32> to vector<8x128xf32>
    %265 = arith.mulf %118, %264 : vector<8x128xf32>
    %266 = arith.addf %262, %265 : vector<8x128xf32>
    %267 = vector.extract_strided_slice %22 {offsets = [6, 0], sizes = [1, 128], strides = [1, 1]} : vector<8x128xf32> to vector<1x128xf32>
    %268 = vector.broadcast %267 : vector<1x128xf32> to vector<8x128xf32>
    %269 = arith.mulf %127, %268 : vector<8x128xf32>
    %270 = arith.addf %266, %269 : vector<8x128xf32>
    %271 = vector.extract_strided_slice %22 {offsets = [7, 0], sizes = [1, 128], strides = [1, 1]} : vector<8x128xf32> to vector<1x128xf32>
    %272 = vector.broadcast %271 : vector<1x128xf32> to vector<8x128xf32>
    %273 = arith.mulf %136, %272 : vector<8x128xf32>
    %274 = arith.addf %270, %273 : vector<8x128xf32>
    %c2_i32 = arith.constant 2 : i32
    %275 = vector.broadcast %c2_i32 : i32 to vector<8x128xi32>
    %276 = arith.cmpi sle, %137, %275 : vector<8x128xi32>
    %cst_45 = arith.constant -1.000000e+30 : f32
    %277 = vector.broadcast %cst_45 : f32 to vector<8x128xf32>
    %278 = arith.select %276, %274, %277 : vector<8x128xi1>, vector<8x128xf32>
    %cst_46 = arith.constant dense<0xFF800000> : vector<128xf32>
    %279 = vector.multi_reduction <maximumf>, %278, %cst_46 [0] : vector<8x128xf32> to vector<128xf32>
    %280 = vector.shape_cast %279 : vector<128xf32> to vector<1x128xf32>
    %281 = vector.broadcast %280 : vector<1x128xf32> to vector<8x128xf32>
    %282 = arith.subf %278, %281 : vector<8x128xf32>
    %283 = math.exp %282 : vector<8x128xf32>
    %cst_47 = arith.constant dense<0.000000e+00> : vector<128xf32>
    %284 = vector.multi_reduction <add>, %283, %cst_47 [0] : vector<8x128xf32> to vector<128xf32>
    %285 = vector.shape_cast %284 : vector<128xf32> to vector<1x128xf32>
    %286 = tpu.reciprocal %285 {approx = true} : vector<1x128xf32> -> vector<1x128xf32>
    %287 = vector.broadcast %286 : vector<1x128xf32> to vector<8x128xf32>
    %288 = arith.mulf %283, %287 : vector<8x128xf32>
    %289 = vector.extract_strided_slice %288 {offsets = [0, 0], sizes = [1, 128], strides = [1, 1]} : vector<8x128xf32> to vector<1x128xf32>
    %290 = vector.broadcast %289 : vector<1x128xf32> to vector<8x128xf32>
    %291 = arith.mulf %290, %8 : vector<8x128xf32>
    %292 = vector.extract_strided_slice %288 {offsets = [1, 0], sizes = [1, 128], strides = [1, 1]} : vector<8x128xf32> to vector<1x128xf32>
    %293 = vector.broadcast %292 : vector<1x128xf32> to vector<8x128xf32>
    %294 = arith.mulf %293, %16 : vector<8x128xf32>
    %295 = arith.addf %291, %294 : vector<8x128xf32>
    %296 = vector.extract_strided_slice %288 {offsets = [2, 0], sizes = [1, 128], strides = [1, 1]} : vector<8x128xf32> to vector<1x128xf32>
    %297 = vector.broadcast %296 : vector<1x128xf32> to vector<8x128xf32>
    %298 = arith.mulf %297, %24 : vector<8x128xf32>
    %299 = arith.addf %295, %298 : vector<8x128xf32>
    %c2_48 = arith.constant 2 : index
    %c0_49 = arith.constant 0 : index
    %c0_50 = arith.constant 0 : index
    %300 = vector.load %arg3[%c2_48, %c0_49, %c0_50] : memref<8x8x128xf32, #tpu.memory_space<vmem>>, vector<1x8x128xf32>
    %301 = vector.shape_cast %300 : vector<1x8x128xf32> to vector<8x128xf32>
    %302 = vector.shape_cast %299 : vector<8x128xf32> to vector<1x8x128xf32>
    tpu.vector_store %arg3[%c2_48, %c0_49, %c0_50], %302 {strides = array<i32>} : memref<8x8x128xf32, #tpu.memory_space<vmem>>, vector<1x8x128xf32>,
    %303 = vector.extract_strided_slice %30 {offsets = [0, 0], sizes = [1, 128], strides = [1, 1]} : vector<8x128xf32> to vector<1x128xf32>
    %304 = vector.broadcast %303 : vector<1x128xf32> to vector<8x128xf32>
    %305 = arith.mulf %73, %304 : vector<8x128xf32>
    %306 = vector.extract_strided_slice %30 {offsets = [1, 0], sizes = [1, 128], strides = [1, 1]} : vector<8x128xf32> to vector<1x128xf32>
    %307 = vector.broadcast %306 : vector<1x128xf32> to vector<8x128xf32>
    %308 = arith.mulf %82, %307 : vector<8x128xf32>
    %309 = arith.addf %305, %308 : vector<8x128xf32>
    %310 = vector.extract_strided_slice %30 {offsets = [2, 0], sizes = [1, 128], strides = [1, 1]} : vector<8x128xf32> to vector<1x128xf32>
    %311 = vector.broadcast %310 : vector<1x128xf32> to vector<8x128xf32>
    %312 = arith.mulf %91, %311 : vector<8x128xf32>
    %313 = arith.addf %309, %312 : vector<8x128xf32>
    %314 = vector.extract_strided_slice %30 {offsets = [3, 0], sizes = [1, 128], strides = [1, 1]} : vector<8x128xf32> to vector<1x128xf32>
    %315 = vector.broadcast %314 : vector<1x128xf32> to vector<8x128xf32>
    %316 = arith.mulf %100, %315 : vector<8x128xf32>
    %317 = arith.addf %313, %316 : vector<8x128xf32>
    %318 = vector.extract_strided_slice %30 {offsets = [4, 0], sizes = [1, 128], strides = [1, 1]} : vector<8x128xf32> to vector<1x128xf32>
    %319 = vector.broadcast %318 : vector<1x128xf32> to vector<8x128xf32>
    %320 = arith.mulf %109, %319 : vector<8x128xf32>
    %321 = arith.addf %317, %320 : vector<8x128xf32>
    %322 = vector.extract_strided_slice %30 {offsets = [5, 0], sizes = [1, 128], strides = [1, 1]} : vector<8x128xf32> to vector<1x128xf32>
    %323 = vector.broadcast %322 : vector<1x128xf32> to vector<8x128xf32>
    %324 = arith.mulf %118, %323 : vector<8x128xf32>
    %325 = arith.addf %321, %324 : vector<8x128xf32>
    %326 = vector.extract_strided_slice %30 {offsets = [6, 0], sizes = [1, 128], strides = [1, 1]} : vector<8x128xf32> to vector<1x128xf32>
    %327 = vector.broadcast %326 : vector<1x128xf32> to vector<8x128xf32>
    %328 = arith.mulf %127, %327 : vector<8x128xf32>
    %329 = arith.addf %325, %328 : vector<8x128xf32>
    %330 = vector.extract_strided_slice %30 {offsets = [7, 0], sizes = [1, 128], strides = [1, 1]} : vector<8x128xf32> to vector<1x128xf32>
    %331 = vector.broadcast %330 : vector<1x128xf32> to vector<8x128xf32>
    %332 = arith.mulf %136, %331 : vector<8x128xf32>
    %333 = arith.addf %329, %332 : vector<8x128xf32>
    %c3_i32 = arith.constant 3 : i32
    %334 = vector.broadcast %c3_i32 : i32 to vector<8x128xi32>
    %335 = arith.cmpi sle, %137, %334 : vector<8x128xi32>
    %cst_51 = arith.constant -1.000000e+30 : f32
    %336 = vector.broadcast %cst_51 : f32 to vector<8x128xf32>
    %337 = arith.select %335, %333, %336 : vector<8x128xi1>, vector<8x128xf32>
    %cst_52 = arith.constant dense<0xFF800000> : vector<128xf32>
    %338 = vector.multi_reduction <maximumf>, %337, %cst_52 [0] : vector<8x128xf32> to vector<128xf32>
    %339 = vector.shape_cast %338 : vector<128xf32> to vector<1x128xf32>
    %340 = vector.broadcast %339 : vector<1x128xf32> to vector<8x128xf32>
    %341 = arith.subf %337, %340 : vector<8x128xf32>
    %342 = math.exp %341 : vector<8x128xf32>
    %cst_53 = arith.constant dense<0.000000e+00> : vector<128xf32>
    %343 = vector.multi_reduction <add>, %342, %cst_53 [0] : vector<8x128xf32> to vector<128xf32>
    %344 = vector.shape_cast %343 : vector<128xf32> to vector<1x128xf32>
    %345 = tpu.reciprocal %344 {approx = true} : vector<1x128xf32> -> vector<1x128xf32>
    %346 = vector.broadcast %345 : vector<1x128xf32> to vector<8x128xf32>
    %347 = arith.mulf %342, %346 : vector<8x128xf32>
    %348 = vector.extract_strided_slice %347 {offsets = [0, 0], sizes = [1, 128], strides = [1, 1]} : vector<8x128xf32> to vector<1x128xf32>
    %349 = vector.broadcast %348 : vector<1x128xf32> to vector<8x128xf32>
    %350 = arith.mulf %349, %8 : vector<8x128xf32>
    %351 = vector.extract_strided_slice %347 {offsets = [1, 0], sizes = [1, 128], strides = [1, 1]} : vector<8x128xf32> to vector<1x128xf32>
    %352 = vector.broadcast %351 : vector<1x128xf32> to vector<8x128xf32>
    %353 = arith.mulf %352, %16 : vector<8x128xf32>
    %354 = arith.addf %350, %353 : vector<8x128xf32>
    %355 = vector.extract_strided_slice %347 {offsets = [2, 0], sizes = [1, 128], strides = [1, 1]} : vector<8x128xf32> to vector<1x128xf32>
    %356 = vector.broadcast %355 : vector<1x128xf32> to vector<8x128xf32>
    %357 = arith.mulf %356, %24 : vector<8x128xf32>
    %358 = arith.addf %354, %357 : vector<8x128xf32>
    %359 = vector.extract_strided_slice %347 {offsets = [3, 0], sizes = [1, 128], strides = [1, 1]} : vector<8x128xf32> to vector<1x128xf32>
    %360 = vector.broadcast %359 : vector<1x128xf32> to vector<8x128xf32>
    %361 = arith.mulf %360, %32 : vector<8x128xf32>
    %362 = arith.addf %358, %361 : vector<8x128xf32>
    %c3_54 = arith.constant 3 : index
    %c0_55 = arith.constant 0 : index
    %c0_56 = arith.constant 0 : index
    %363 = vector.load %arg3[%c3_54, %c0_55, %c0_56] : memref<8x8x128xf32, #tpu.memory_space<vmem>>, vector<1x8x128xf32>
    %364 = vector.shape_cast %363 : vector<1x8x128xf32> to vector<8x128xf32>
    %365 = vector.shape_cast %362 : vector<8x128xf32> to vector<1x8x128xf32>
    tpu.vector_store %arg3[%c3_54, %c0_55, %c0_56], %365 {strides = array<i32>} : memref<8x8x128xf32, #tpu.memory_space<vmem>>, vector<1x8x128xf32>,
    %366 = vector.extract_strided_slice %38 {offsets = [0, 0], sizes = [1, 128], strides = [1, 1]} : vector<8x128xf32> to vector<1x128xf32>
    %367 = vector.broadcast %366 : vector<1x128xf32> to vector<8x128xf32>
    %368 = arith.mulf %73, %367 : vector<8x128xf32>
    %369 = vector.extract_strided_slice %38 {offsets = [1, 0], sizes = [1, 128], strides = [1, 1]} : vector<8x128xf32> to vector<1x128xf32>
    %370 = vector.broadcast %369 : vector<1x128xf32> to vector<8x128xf32>
    %371 = arith.mulf %82, %370 : vector<8x128xf32>
    %372 = arith.addf %368, %371 : vector<8x128xf32>
    %373 = vector.extract_strided_slice %38 {offsets = [2, 0], sizes = [1, 128], strides = [1, 1]} : vector<8x128xf32> to vector<1x128xf32>
    %374 = vector.broadcast %373 : vector<1x128xf32> to vector<8x128xf32>
    %375 = arith.mulf %91, %374 : vector<8x128xf32>
    %376 = arith.addf %372, %375 : vector<8x128xf32>
    %377 = vector.extract_strided_slice %38 {offsets = [3, 0], sizes = [1, 128], strides = [1, 1]} : vector<8x128xf32> to vector<1x128xf32>
    %378 = vector.broadcast %377 : vector<1x128xf32> to vector<8x128xf32>
    %379 = arith.mulf %100, %378 : vector<8x128xf32>
    %380 = arith.addf %376, %379 : vector<8x128xf32>
    %381 = vector.extract_strided_slice %38 {offsets = [4, 0], sizes = [1, 128], strides = [1, 1]} : vector<8x128xf32> to vector<1x128xf32>
    %382 = vector.broadcast %381 : vector<1x128xf32> to vector<8x128xf32>
    %383 = arith.mulf %109, %382 : vector<8x128xf32>
    %384 = arith.addf %380, %383 : vector<8x128xf32>
    %385 = vector.extract_strided_slice %38 {offsets = [5, 0], sizes = [1, 128], strides = [1, 1]} : vector<8x128xf32> to vector<1x128xf32>
    %386 = vector.broadcast %385 : vector<1x128xf32> to vector<8x128xf32>
    %387 = arith.mulf %118, %386 : vector<8x128xf32>
    %388 = arith.addf %384, %387 : vector<8x128xf32>
    %389 = vector.extract_strided_slice %38 {offsets = [6, 0], sizes = [1, 128], strides = [1, 1]} : vector<8x128xf32> to vector<1x128xf32>
    %390 = vector.broadcast %389 : vector<1x128xf32> to vector<8x128xf32>
    %391 = arith.mulf %127, %390 : vector<8x128xf32>
    %392 = arith.addf %388, %391 : vector<8x128xf32>
    %393 = vector.extract_strided_slice %38 {offsets = [7, 0], sizes = [1, 128], strides = [1, 1]} : vector<8x128xf32> to vector<1x128xf32>
    %394 = vector.broadcast %393 : vector<1x128xf32> to vector<8x128xf32>
    %395 = arith.mulf %136, %394 : vector<8x128xf32>
    %396 = arith.addf %392, %395 : vector<8x128xf32>
    %c4_i32 = arith.constant 4 : i32
    %397 = vector.broadcast %c4_i32 : i32 to vector<8x128xi32>
    %398 = arith.cmpi sle, %137, %397 : vector<8x128xi32>
    %cst_57 = arith.constant -1.000000e+30 : f32
    %399 = vector.broadcast %cst_57 : f32 to vector<8x128xf32>
    %400 = arith.select %398, %396, %399 : vector<8x128xi1>, vector<8x128xf32>
    %cst_58 = arith.constant dense<0xFF800000> : vector<128xf32>
    %401 = vector.multi_reduction <maximumf>, %400, %cst_58 [0] : vector<8x128xf32> to vector<128xf32>
    %402 = vector.shape_cast %401 : vector<128xf32> to vector<1x128xf32>
    %403 = vector.broadcast %402 : vector<1x128xf32> to vector<8x128xf32>
    %404 = arith.subf %400, %403 : vector<8x128xf32>
    %405 = math.exp %404 : vector<8x128xf32>
    %cst_59 = arith.constant dense<0.000000e+00> : vector<128xf32>
    %406 = vector.multi_reduction <add>, %405, %cst_59 [0] : vector<8x128xf32> to vector<128xf32>
    %407 = vector.shape_cast %406 : vector<128xf32> to vector<1x128xf32>
    %408 = tpu.reciprocal %407 {approx = true} : vector<1x128xf32> -> vector<1x128xf32>
    %409 = vector.broadcast %408 : vector<1x128xf32> to vector<8x128xf32>
    %410 = arith.mulf %405, %409 : vector<8x128xf32>
    %411 = vector.extract_strided_slice %410 {offsets = [0, 0], sizes = [1, 128], strides = [1, 1]} : vector<8x128xf32> to vector<1x128xf32>
    %412 = vector.broadcast %411 : vector<1x128xf32> to vector<8x128xf32>
    %413 = arith.mulf %412, %8 : vector<8x128xf32>
    %414 = vector.extract_strided_slice %410 {offsets = [1, 0], sizes = [1, 128], strides = [1, 1]} : vector<8x128xf32> to vector<1x128xf32>
    %415 = vector.broadcast %414 : vector<1x128xf32> to vector<8x128xf32>
    %416 = arith.mulf %415, %16 : vector<8x128xf32>
    %417 = arith.addf %413, %416 : vector<8x128xf32>
    %418 = vector.extract_strided_slice %410 {offsets = [2, 0], sizes = [1, 128], strides = [1, 1]} : vector<8x128xf32> to vector<1x128xf32>
    %419 = vector.broadcast %418 : vector<1x128xf32> to vector<8x128xf32>
    %420 = arith.mulf %419, %24 : vector<8x128xf32>
    %421 = arith.addf %417, %420 : vector<8x128xf32>
    %422 = vector.extract_strided_slice %410 {offsets = [3, 0], sizes = [1, 128], strides = [1, 1]} : vector<8x128xf32> to vector<1x128xf32>
    %423 = vector.broadcast %422 : vector<1x128xf32> to vector<8x128xf32>
    %424 = arith.mulf %423, %32 : vector<8x128xf32>
    %425 = arith.addf %421, %424 : vector<8x128xf32>
    %426 = vector.extract_strided_slice %410 {offsets = [4, 0], sizes = [1, 128], strides = [1, 1]} : vector<8x128xf32> to vector<1x128xf32>
    %427 = vector.broadcast %426 : vector<1x128xf32> to vector<8x128xf32>
    %428 = arith.mulf %427, %40 : vector<8x128xf32>
    %429 = arith.addf %425, %428 : vector<8x128xf32>
    %c4_60 = arith.constant 4 : index
    %c0_61 = arith.constant 0 : index
    %c0_62 = arith.constant 0 : index
    %430 = vector.load %arg3[%c4_60, %c0_61, %c0_62] : memref<8x8x128xf32, #tpu.memory_space<vmem>>, vector<1x8x128xf32>
    %431 = vector.shape_cast %430 : vector<1x8x128xf32> to vector<8x128xf32>
    %432 = vector.shape_cast %429 : vector<8x128xf32> to vector<1x8x128xf32>
    tpu.vector_store %arg3[%c4_60, %c0_61, %c0_62], %432 {strides = array<i32>} : memref<8x8x128xf32, #tpu.memory_space<vmem>>, vector<1x8x128xf32>,
    %433 = vector.extract_strided_slice %46 {offsets = [0, 0], sizes = [1, 128], strides = [1, 1]} : vector<8x128xf32> to vector<1x128xf32>
    %434 = vector.broadcast %433 : vector<1x128xf32> to vector<8x128xf32>
    %435 = arith.mulf %73, %434 : vector<8x128xf32>
    %436 = vector.extract_strided_slice %46 {offsets = [1, 0], sizes = [1, 128], strides = [1, 1]} : vector<8x128xf32> to vector<1x128xf32>
    %437 = vector.broadcast %436 : vector<1x128xf32> to vector<8x128xf32>
    %438 = arith.mulf %82, %437 : vector<8x128xf32>
    %439 = arith.addf %435, %438 : vector<8x128xf32>
    %440 = vector.extract_strided_slice %46 {offsets = [2, 0], sizes = [1, 128], strides = [1, 1]} : vector<8x128xf32> to vector<1x128xf32>
    %441 = vector.broadcast %440 : vector<1x128xf32> to vector<8x128xf32>
    %442 = arith.mulf %91, %441 : vector<8x128xf32>
    %443 = arith.addf %439, %442 : vector<8x128xf32>
    %444 = vector.extract_strided_slice %46 {offsets = [3, 0], sizes = [1, 128], strides = [1, 1]} : vector<8x128xf32> to vector<1x128xf32>
    %445 = vector.broadcast %444 : vector<1x128xf32> to vector<8x128xf32>
    %446 = arith.mulf %100, %445 : vector<8x128xf32>
    %447 = arith.addf %443, %446 : vector<8x128xf32>
    %448 = vector.extract_strided_slice %46 {offsets = [4, 0], sizes = [1, 128], strides = [1, 1]} : vector<8x128xf32> to vector<1x128xf32>
    %449 = vector.broadcast %448 : vector<1x128xf32> to vector<8x128xf32>
    %450 = arith.mulf %109, %449 : vector<8x128xf32>
    %451 = arith.addf %447, %450 : vector<8x128xf32>
    %452 = vector.extract_strided_slice %46 {offsets = [5, 0], sizes = [1, 128], strides = [1, 1]} : vector<8x128xf32> to vector<1x128xf32>
    %453 = vector.broadcast %452 : vector<1x128xf32> to vector<8x128xf32>
    %454 = arith.mulf %118, %453 : vector<8x128xf32>
    %455 = arith.addf %451, %454 : vector<8x128xf32>
    %456 = vector.extract_strided_slice %46 {offsets = [6, 0], sizes = [1, 128], strides = [1, 1]} : vector<8x128xf32> to vector<1x128xf32>
    %457 = vector.broadcast %456 : vector<1x128xf32> to vector<8x128xf32>
    %458 = arith.mulf %127, %457 : vector<8x128xf32>
    %459 = arith.addf %455, %458 : vector<8x128xf32>
    %460 = vector.extract_strided_slice %46 {offsets = [7, 0], sizes = [1, 128], strides = [1, 1]} : vector<8x128xf32> to vector<1x128xf32>
    %461 = vector.broadcast %460 : vector<1x128xf32> to vector<8x128xf32>
    %462 = arith.mulf %136, %461 : vector<8x128xf32>
    %463 = arith.addf %459, %462 : vector<8x128xf32>
    %c5_i32 = arith.constant 5 : i32
    %464 = vector.broadcast %c5_i32 : i32 to vector<8x128xi32>
    %465 = arith.cmpi sle, %137, %464 : vector<8x128xi32>
    %cst_63 = arith.constant -1.000000e+30 : f32
    %466 = vector.broadcast %cst_63 : f32 to vector<8x128xf32>
    %467 = arith.select %465, %463, %466 : vector<8x128xi1>, vector<8x128xf32>
    %cst_64 = arith.constant dense<0xFF800000> : vector<128xf32>
    %468 = vector.multi_reduction <maximumf>, %467, %cst_64 [0] : vector<8x128xf32> to vector<128xf32>
    %469 = vector.shape_cast %468 : vector<128xf32> to vector<1x128xf32>
    %470 = vector.broadcast %469 : vector<1x128xf32> to vector<8x128xf32>
    %471 = arith.subf %467, %470 : vector<8x128xf32>
    %472 = math.exp %471 : vector<8x128xf32>
    %cst_65 = arith.constant dense<0.000000e+00> : vector<128xf32>
    %473 = vector.multi_reduction <add>, %472, %cst_65 [0] : vector<8x128xf32> to vector<128xf32>
    %474 = vector.shape_cast %473 : vector<128xf32> to vector<1x128xf32>
    %475 = tpu.reciprocal %474 {approx = true} : vector<1x128xf32> -> vector<1x128xf32>
    %476 = vector.broadcast %475 : vector<1x128xf32> to vector<8x128xf32>
    %477 = arith.mulf %472, %476 : vector<8x128xf32>
    %478 = vector.extract_strided_slice %477 {offsets = [0, 0], sizes = [1, 128], strides = [1, 1]} : vector<8x128xf32> to vector<1x128xf32>
    %479 = vector.broadcast %478 : vector<1x128xf32> to vector<8x128xf32>
    %480 = arith.mulf %479, %8 : vector<8x128xf32>
    %481 = vector.extract_strided_slice %477 {offsets = [1, 0], sizes = [1, 128], strides = [1, 1]} : vector<8x128xf32> to vector<1x128xf32>
    %482 = vector.broadcast %481 : vector<1x128xf32> to vector<8x128xf32>
    %483 = arith.mulf %482, %16 : vector<8x128xf32>
    %484 = arith.addf %480, %483 : vector<8x128xf32>
    %485 = vector.extract_strided_slice %477 {offsets = [2, 0], sizes = [1, 128], strides = [1, 1]} : vector<8x128xf32> to vector<1x128xf32>
    %486 = vector.broadcast %485 : vector<1x128xf32> to vector<8x128xf32>
    %487 = arith.mulf %486, %24 : vector<8x128xf32>
    %488 = arith.addf %484, %487 : vector<8x128xf32>
    %489 = vector.extract_strided_slice %477 {offsets = [3, 0], sizes = [1, 128], strides = [1, 1]} : vector<8x128xf32> to vector<1x128xf32>
    %490 = vector.broadcast %489 : vector<1x128xf32> to vector<8x128xf32>
    %491 = arith.mulf %490, %32 : vector<8x128xf32>
    %492 = arith.addf %488, %491 : vector<8x128xf32>
    %493 = vector.extract_strided_slice %477 {offsets = [4, 0], sizes = [1, 128], strides = [1, 1]} : vector<8x128xf32> to vector<1x128xf32>
    %494 = vector.broadcast %493 : vector<1x128xf32> to vector<8x128xf32>
    %495 = arith.mulf %494, %40 : vector<8x128xf32>
    %496 = arith.addf %492, %495 : vector<8x128xf32>
    %497 = vector.extract_strided_slice %477 {offsets = [5, 0], sizes = [1, 128], strides = [1, 1]} : vector<8x128xf32> to vector<1x128xf32>
    %498 = vector.broadcast %497 : vector<1x128xf32> to vector<8x128xf32>
    %499 = arith.mulf %498, %48 : vector<8x128xf32>
    %500 = arith.addf %496, %499 : vector<8x128xf32>
    %c5_66 = arith.constant 5 : index
    %c0_67 = arith.constant 0 : index
    %c0_68 = arith.constant 0 : index
    %501 = vector.load %arg3[%c5_66, %c0_67, %c0_68] : memref<8x8x128xf32, #tpu.memory_space<vmem>>, vector<1x8x128xf32>
    %502 = vector.shape_cast %501 : vector<1x8x128xf32> to vector<8x128xf32>
    %503 = vector.shape_cast %500 : vector<8x128xf32> to vector<1x8x128xf32>
    tpu.vector_store %arg3[%c5_66, %c0_67, %c0_68], %503 {strides = array<i32>} : memref<8x8x128xf32, #tpu.memory_space<vmem>>, vector<1x8x128xf32>,
    %504 = vector.extract_strided_slice %54 {offsets = [0, 0], sizes = [1, 128], strides = [1, 1]} : vector<8x128xf32> to vector<1x128xf32>
    %505 = vector.broadcast %504 : vector<1x128xf32> to vector<8x128xf32>
    %506 = arith.mulf %73, %505 : vector<8x128xf32>
    %507 = vector.extract_strided_slice %54 {offsets = [1, 0], sizes = [1, 128], strides = [1, 1]} : vector<8x128xf32> to vector<1x128xf32>
    %508 = vector.broadcast %507 : vector<1x128xf32> to vector<8x128xf32>
    %509 = arith.mulf %82, %508 : vector<8x128xf32>
    %510 = arith.addf %506, %509 : vector<8x128xf32>
    %511 = vector.extract_strided_slice %54 {offsets = [2, 0], sizes = [1, 128], strides = [1, 1]} : vector<8x128xf32> to vector<1x128xf32>
    %512 = vector.broadcast %511 : vector<1x128xf32> to vector<8x128xf32>
    %513 = arith.mulf %91, %512 : vector<8x128xf32>
    %514 = arith.addf %510, %513 : vector<8x128xf32>
    %515 = vector.extract_strided_slice %54 {offsets = [3, 0], sizes = [1, 128], strides = [1, 1]} : vector<8x128xf32> to vector<1x128xf32>
    %516 = vector.broadcast %515 : vector<1x128xf32> to vector<8x128xf32>
    %517 = arith.mulf %100, %516 : vector<8x128xf32>
    %518 = arith.addf %514, %517 : vector<8x128xf32>
    %519 = vector.extract_strided_slice %54 {offsets = [4, 0], sizes = [1, 128], strides = [1, 1]} : vector<8x128xf32> to vector<1x128xf32>
    %520 = vector.broadcast %519 : vector<1x128xf32> to vector<8x128xf32>
    %521 = arith.mulf %109, %520 : vector<8x128xf32>
    %522 = arith.addf %518, %521 : vector<8x128xf32>
    %523 = vector.extract_strided_slice %54 {offsets = [5, 0], sizes = [1, 128], strides = [1, 1]} : vector<8x128xf32> to vector<1x128xf32>
    %524 = vector.broadcast %523 : vector<1x128xf32> to vector<8x128xf32>
    %525 = arith.mulf %118, %524 : vector<8x128xf32>
    %526 = arith.addf %522, %525 : vector<8x128xf32>
    %527 = vector.extract_strided_slice %54 {offsets = [6, 0], sizes = [1, 128], strides = [1, 1]} : vector<8x128xf32> to vector<1x128xf32>
    %528 = vector.broadcast %527 : vector<1x128xf32> to vector<8x128xf32>
    %529 = arith.mulf %127, %528 : vector<8x128xf32>
    %530 = arith.addf %526, %529 : vector<8x128xf32>
    %531 = vector.extract_strided_slice %54 {offsets = [7, 0], sizes = [1, 128], strides = [1, 1]} : vector<8x128xf32> to vector<1x128xf32>
    %532 = vector.broadcast %531 : vector<1x128xf32> to vector<8x128xf32>
    %533 = arith.mulf %136, %532 : vector<8x128xf32>
    %534 = arith.addf %530, %533 : vector<8x128xf32>
    %c6_i32 = arith.constant 6 : i32
    %535 = vector.broadcast %c6_i32 : i32 to vector<8x128xi32>
    %536 = arith.cmpi sle, %137, %535 : vector<8x128xi32>
    %cst_69 = arith.constant -1.000000e+30 : f32
    %537 = vector.broadcast %cst_69 : f32 to vector<8x128xf32>
    %538 = arith.select %536, %534, %537 : vector<8x128xi1>, vector<8x128xf32>
    %cst_70 = arith.constant dense<0xFF800000> : vector<128xf32>
    %539 = vector.multi_reduction <maximumf>, %538, %cst_70 [0] : vector<8x128xf32> to vector<128xf32>
    %540 = vector.shape_cast %539 : vector<128xf32> to vector<1x128xf32>
    %541 = vector.broadcast %540 : vector<1x128xf32> to vector<8x128xf32>
    %542 = arith.subf %538, %541 : vector<8x128xf32>
    %543 = math.exp %542 : vector<8x128xf32>
    %cst_71 = arith.constant dense<0.000000e+00> : vector<128xf32>
    %544 = vector.multi_reduction <add>, %543, %cst_71 [0] : vector<8x128xf32> to vector<128xf32>
    %545 = vector.shape_cast %544 : vector<128xf32> to vector<1x128xf32>
    %546 = tpu.reciprocal %545 {approx = true} : vector<1x128xf32> -> vector<1x128xf32>
    %547 = vector.broadcast %546 : vector<1x128xf32> to vector<8x128xf32>
    %548 = arith.mulf %543, %547 : vector<8x128xf32>
    %549 = vector.extract_strided_slice %548 {offsets = [0, 0], sizes = [1, 128], strides = [1, 1]} : vector<8x128xf32> to vector<1x128xf32>
    %550 = vector.broadcast %549 : vector<1x128xf32> to vector<8x128xf32>
    %551 = arith.mulf %550, %8 : vector<8x128xf32>
    %552 = vector.extract_strided_slice %548 {offsets = [1, 0], sizes = [1, 128], strides = [1, 1]} : vector<8x128xf32> to vector<1x128xf32>
    %553 = vector.broadcast %552 : vector<1x128xf32> to vector<8x128xf32>
    %554 = arith.mulf %553, %16 : vector<8x128xf32>
    %555 = arith.addf %551, %554 : vector<8x128xf32>
    %556 = vector.extract_strided_slice %548 {offsets = [2, 0], sizes = [1, 128], strides = [1, 1]} : vector<8x128xf32> to vector<1x128xf32>
    %557 = vector.broadcast %556 : vector<1x128xf32> to vector<8x128xf32>
    %558 = arith.mulf %557, %24 : vector<8x128xf32>
    %559 = arith.addf %555, %558 : vector<8x128xf32>
    %560 = vector.extract_strided_slice %548 {offsets = [3, 0], sizes = [1, 128], strides = [1, 1]} : vector<8x128xf32> to vector<1x128xf32>
    %561 = vector.broadcast %560 : vector<1x128xf32> to vector<8x128xf32>
    %562 = arith.mulf %561, %32 : vector<8x128xf32>
    %563 = arith.addf %559, %562 : vector<8x128xf32>
    %564 = vector.extract_strided_slice %548 {offsets = [4, 0], sizes = [1, 128], strides = [1, 1]} : vector<8x128xf32> to vector<1x128xf32>
    %565 = vector.broadcast %564 : vector<1x128xf32> to vector<8x128xf32>
    %566 = arith.mulf %565, %40 : vector<8x128xf32>
    %567 = arith.addf %563, %566 : vector<8x128xf32>
    %568 = vector.extract_strided_slice %548 {offsets = [5, 0], sizes = [1, 128], strides = [1, 1]} : vector<8x128xf32> to vector<1x128xf32>
    %569 = vector.broadcast %568 : vector<1x128xf32> to vector<8x128xf32>
    %570 = arith.mulf %569, %48 : vector<8x128xf32>
    %571 = arith.addf %567, %570 : vector<8x128xf32>
    %572 = vector.extract_strided_slice %548 {offsets = [6, 0], sizes = [1, 128], strides = [1, 1]} : vector<8x128xf32> to vector<1x128xf32>
    %573 = vector.broadcast %572 : vector<1x128xf32> to vector<8x128xf32>
    %574 = arith.mulf %573, %56 : vector<8x128xf32>
    %575 = arith.addf %571, %574 : vector<8x128xf32>
    %c6_72 = arith.constant 6 : index
    %c0_73 = arith.constant 0 : index
    %c0_74 = arith.constant 0 : index
    %576 = vector.load %arg3[%c6_72, %c0_73, %c0_74] : memref<8x8x128xf32, #tpu.memory_space<vmem>>, vector<1x8x128xf32>
    %577 = vector.shape_cast %576 : vector<1x8x128xf32> to vector<8x128xf32>
    %578 = vector.shape_cast %575 : vector<8x128xf32> to vector<1x8x128xf32>
    tpu.vector_store %arg3[%c6_72, %c0_73, %c0_74], %578 {strides = array<i32>} : memref<8x8x128xf32, #tpu.memory_space<vmem>>, vector<1x8x128xf32>,
    %579 = vector.extract_strided_slice %62 {offsets = [0, 0], sizes = [1, 128], strides = [1, 1]} : vector<8x128xf32> to vector<1x128xf32>
    %580 = vector.broadcast %579 : vector<1x128xf32> to vector<8x128xf32>
    %581 = arith.mulf %73, %580 : vector<8x128xf32>
    %582 = vector.extract_strided_slice %62 {offsets = [1, 0], sizes = [1, 128], strides = [1, 1]} : vector<8x128xf32> to vector<1x128xf32>
    %583 = vector.broadcast %582 : vector<1x128xf32> to vector<8x128xf32>
    %584 = arith.mulf %82, %583 : vector<8x128xf32>
    %585 = arith.addf %581, %584 : vector<8x128xf32>
    %586 = vector.extract_strided_slice %62 {offsets = [2, 0], sizes = [1, 128], strides = [1, 1]} : vector<8x128xf32> to vector<1x128xf32>
    %587 = vector.broadcast %586 : vector<1x128xf32> to vector<8x128xf32>
    %588 = arith.mulf %91, %587 : vector<8x128xf32>
    %589 = arith.addf %585, %588 : vector<8x128xf32>
    %590 = vector.extract_strided_slice %62 {offsets = [3, 0], sizes = [1, 128], strides = [1, 1]} : vector<8x128xf32> to vector<1x128xf32>
    %591 = vector.broadcast %590 : vector<1x128xf32> to vector<8x128xf32>
    %592 = arith.mulf %100, %591 : vector<8x128xf32>
    %593 = arith.addf %589, %592 : vector<8x128xf32>
    %594 = vector.extract_strided_slice %62 {offsets = [4, 0], sizes = [1, 128], strides = [1, 1]} : vector<8x128xf32> to vector<1x128xf32>
    %595 = vector.broadcast %594 : vector<1x128xf32> to vector<8x128xf32>
    %596 = arith.mulf %109, %595 : vector<8x128xf32>
    %597 = arith.addf %593, %596 : vector<8x128xf32>
    %598 = vector.extract_strided_slice %62 {offsets = [5, 0], sizes = [1, 128], strides = [1, 1]} : vector<8x128xf32> to vector<1x128xf32>
    %599 = vector.broadcast %598 : vector<1x128xf32> to vector<8x128xf32>
    %600 = arith.mulf %118, %599 : vector<8x128xf32>
    %601 = arith.addf %597, %600 : vector<8x128xf32>
    %602 = vector.extract_strided_slice %62 {offsets = [6, 0], sizes = [1, 128], strides = [1, 1]} : vector<8x128xf32> to vector<1x128xf32>
    %603 = vector.broadcast %602 : vector<1x128xf32> to vector<8x128xf32>
    %604 = arith.mulf %127, %603 : vector<8x128xf32>
    %605 = arith.addf %601, %604 : vector<8x128xf32>
    %606 = vector.extract_strided_slice %62 {offsets = [7, 0], sizes = [1, 128], strides = [1, 1]} : vector<8x128xf32> to vector<1x128xf32>
    %607 = vector.broadcast %606 : vector<1x128xf32> to vector<8x128xf32>
    %608 = arith.mulf %136, %607 : vector<8x128xf32>
    %609 = arith.addf %605, %608 : vector<8x128xf32>
    %c7_i32 = arith.constant 7 : i32
    %610 = vector.broadcast %c7_i32 : i32 to vector<8x128xi32>
    %611 = arith.cmpi sle, %137, %610 : vector<8x128xi32>
    %cst_75 = arith.constant -1.000000e+30 : f32
    %612 = vector.broadcast %cst_75 : f32 to vector<8x128xf32>
    %613 = arith.select %611, %609, %612 : vector<8x128xi1>, vector<8x128xf32>
    %cst_76 = arith.constant dense<0xFF800000> : vector<128xf32>
    %614 = vector.multi_reduction <maximumf>, %613, %cst_76 [0] : vector<8x128xf32> to vector<128xf32>
    %615 = vector.shape_cast %614 : vector<128xf32> to vector<1x128xf32>
    %616 = vector.broadcast %615 : vector<1x128xf32> to vector<8x128xf32>
    %617 = arith.subf %613, %616 : vector<8x128xf32>
    %618 = math.exp %617 : vector<8x128xf32>
    %cst_77 = arith.constant dense<0.000000e+00> : vector<128xf32>
    %619 = vector.multi_reduction <add>, %618, %cst_77 [0] : vector<8x128xf32> to vector<128xf32>
    %620 = vector.shape_cast %619 : vector<128xf32> to vector<1x128xf32>
    %621 = tpu.reciprocal %620 {approx = true} : vector<1x128xf32> -> vector<1x128xf32>
    %622 = vector.broadcast %621 : vector<1x128xf32> to vector<8x128xf32>
    %623 = arith.mulf %618, %622 : vector<8x128xf32>
    %624 = vector.extract_strided_slice %623 {offsets = [0, 0], sizes = [1, 128], strides = [1, 1]} : vector<8x128xf32> to vector<1x128xf32>
    %625 = vector.broadcast %624 : vector<1x128xf32> to vector<8x128xf32>
    %626 = arith.mulf %625, %8 : vector<8x128xf32>
    %627 = vector.extract_strided_slice %623 {offsets = [1, 0], sizes = [1, 128], strides = [1, 1]} : vector<8x128xf32> to vector<1x128xf32>
    %628 = vector.broadcast %627 : vector<1x128xf32> to vector<8x128xf32>
    %629 = arith.mulf %628, %16 : vector<8x128xf32>
    %630 = arith.addf %626, %629 : vector<8x128xf32>
    %631 = vector.extract_strided_slice %623 {offsets = [2, 0], sizes = [1, 128], strides = [1, 1]} : vector<8x128xf32> to vector<1x128xf32>
    %632 = vector.broadcast %631 : vector<1x128xf32> to vector<8x128xf32>
    %633 = arith.mulf %632, %24 : vector<8x128xf32>
    %634 = arith.addf %630, %633 : vector<8x128xf32>
    %635 = vector.extract_strided_slice %623 {offsets = [3, 0], sizes = [1, 128], strides = [1, 1]} : vector<8x128xf32> to vector<1x128xf32>
    %636 = vector.broadcast %635 : vector<1x128xf32> to vector<8x128xf32>
    %637 = arith.mulf %636, %32 : vector<8x128xf32>
    %638 = arith.addf %634, %637 : vector<8x128xf32>
    %639 = vector.extract_strided_slice %623 {offsets = [4, 0], sizes = [1, 128], strides = [1, 1]} : vector<8x128xf32> to vector<1x128xf32>
    %640 = vector.broadcast %639 : vector<1x128xf32> to vector<8x128xf32>
    %641 = arith.mulf %640, %40 : vector<8x128xf32>
    %642 = arith.addf %638, %641 : vector<8x128xf32>
    %643 = vector.extract_strided_slice %623 {offsets = [5, 0], sizes = [1, 128], strides = [1, 1]} : vector<8x128xf32> to vector<1x128xf32>
    %644 = vector.broadcast %643 : vector<1x128xf32> to vector<8x128xf32>
    %645 = arith.mulf %644, %48 : vector<8x128xf32>
    %646 = arith.addf %642, %645 : vector<8x128xf32>
    %647 = vector.extract_strided_slice %623 {offsets = [6, 0], sizes = [1, 128], strides = [1, 1]} : vector<8x128xf32> to vector<1x128xf32>
    %648 = vector.broadcast %647 : vector<1x128xf32> to vector<8x128xf32>
    %649 = arith.mulf %648, %56 : vector<8x128xf32>
    %650 = arith.addf %646, %649 : vector<8x128xf32>
    %651 = vector.extract_strided_slice %623 {offsets = [7, 0], sizes = [1, 128], strides = [1, 1]} : vector<8x128xf32> to vector<1x128xf32>
    %652 = vector.broadcast %651 : vector<1x128xf32> to vector<8x128xf32>
    %653 = arith.mulf %652, %64 : vector<8x128xf32>
    %654 = arith.addf %650, %653 : vector<8x128xf32>
    %c7_78 = arith.constant 7 : index
    %c0_79 = arith.constant 0 : index
    %c0_80 = arith.constant 0 : index
    %655 = vector.load %arg3[%c7_78, %c0_79, %c0_80] : memref<8x8x128xf32, #tpu.memory_space<vmem>>, vector<1x8x128xf32>
    %656 = vector.shape_cast %655 : vector<1x8x128xf32> to vector<8x128xf32>
    %657 = vector.shape_cast %654 : vector<8x128xf32> to vector<1x8x128xf32>
    tpu.vector_store %arg3[%c7_78, %c0_79, %c0_80], %657 {strides = array<i32>} : memref<8x8x128xf32, #tpu.memory_space<vmem>>, vector<1x8x128xf32>,
    return
  }
  func.func @transform_0(%arg0: i32) -> (i32, i32, i32) {
    %c0_i32 = arith.constant 0 : i32
    %c0_i32_0 = arith.constant 0 : i32
    %c0_i32_1 = arith.constant 0 : i32
    return %c0_i32, %c0_i32_0, %arg0 : i32, i32, i32
  }
  func.func @transform_1(%arg0: i32) -> (i32, i32) {
    %c0_i32 = arith.constant 0 : i32
    %c0_i32_0 = arith.constant 0 : i32
    %c0_i32_1 = arith.constant 0 : i32
    return %c0_i32, %c0_i32_0 : i32, i32
  }
  func.func @transform_2(%arg0: i32) -> (i32, i32, i32) {
    %c0_i32 = arith.constant 0 : i32
    %c0_i32_0 = arith.constant 0 : i32
    %c0_i32_1 = arith.constant 0 : i32
    return %c0_i32, %c0_i32_0, %arg0 : i32, i32, i32
  }
}

</mosaic_0001>

<bundles_post_ra>
// kernel: head_forward.1
= control target key start
LH: loop header
LB: loop body
LE: loop exit
PB: predicated region body
PF: predicated region fallthrough
CT: control target
= control target key end

     0   :  { %v1985_v0 = vmov 0.0|0.0   ;;  %vm1986_vm0 = vmmov 0   ;;  %v1987_v8 = vmov 0.0   ;;  %vm18_vm1 = vcmask 261120   ;;  %s2906_s0 = inlined_call_operand.vmem [shape: f32[8,32,128], index: 0, kind: input, shape index: {}]   ;;  %s2907_s1 = inlined_call_operand.vmem [shape: f32[24,32], index: 1, kind: input, shape index: {}]   ;;  %s2908_s2 = inlined_call_operand.vmem [shape: f32[8,8,128], index: 2, kind: output, shape index: {}]  }
   0x1   :  { %1902 = vmatprep.subr.bf16.mxu0 %v1985_v0  ;;  %1908 = vmatprep.subr.bf16.mxu1 %v1985_v0  ;;  %v14_v1 = vld [vmem:[%s2906_s0] sm:$0xff]  ;;  %v15_v2 = vld [vmem:[%s2906_s0 + $0x8] sm:$0xff]  ;;  %v16_v6 = vld [vmem:[%s2906_s0 + $0x10] sm:$0xff]  ;;  %v894_v53 = vlaneseq  ;;  %vm732_vm2 = vcmask 1040384   ;;  %vm734_vm3 = vcmask 1041408   ;;  %vm736_vm4 = vcmask 1042432  }
   0x2   :  { %v1654_v3 = vld [vmem:[%s2906_s0 + $0x20] sm:$0xff]  ;;  %v1903_v4 = vpack.c.bf16 %v15_v2, %v14_v1  ;;  %v1655_v5 = vld [vmem:[%s2906_s0 + $0x28] sm:$0xff]  ;;  %v17_v7 = vld [vmem:[%s2906_s0 + $0x18] sm:$0xff]  ;;  %1774 = vmatprep.mubr.msk.f32.mxu0 %vm1986_vm0, %v1987_v8  ;;  %1791 = vmatprep.mubr.msk.f32.mxu1 %vm1986_vm0, %v1987_v8  ;;  %vm738_vm5 = vcmask 1043456   ;;  %vm740_vm6 = vcmask 1044480   ;;  %vm742_vm7 = vcmask 1045504  }
   0x3   :  { %v1909_v9 = vpack.c.bf16 %v1655_v5, %v1654_v3  ;;  %v1656_v10 = vld [vmem:[%s2906_s0 + $0x30] sm:$0xff]  ;;  %v1657_v11 = vld [vmem:[%s2906_s0 + $0x38] sm:$0xff]  ;;  %v1906_v12 = vpack.c.bf16 %v17_v7, %v16_v6  ;;  %v1661_v14 = vld [vmem:[%s2906_s0 + $0x40] sm:$0xff]  ;;  %v2226_v54 = vshrl.u32 %v894_v53, 7  ;;  %vm744_vm8 = vcmask 1046528  }
   0x4   :  { %1904 = vmatpush3.bf16.msra.mxu0 %v1903_v4  ;;  %v1912_v13 = vpack.c.bf16 %v1657_v11, %v1656_v10  ;;  %v1662_v15 = vld [vmem:[%s2906_s0 + $0x48] sm:$0xff]  ;;  %v1668_v16 = vld [vmem:[%s2906_s0 + $0x60] sm:$0xff]  ;;  %v1663_v21 = vld [vmem:[%s2906_s0 + $0x50] sm:$0xff] }
   0x5   :  { %1910 = vmatpush3.bf16.msra.mxu1 %v1909_v9  ;;  %1905 = vmatprep.subr.bf16.mxu0 %v1985_v0  ;;  %v1669_v17 = vld [vmem:[%s2906_s0 + $0x68] sm:$0xff]  ;;  %v2050_v18 = vld [vmem:[%s2907_s1] sm:$0xff]  ;;  %v1915_v19 = vpack.c.bf16 %v1662_v15, %v1661_v14  ;;  %v1664_v22 = vld [vmem:[%s2906_s0 + $0x58] sm:$0xff]  ;;  %v2229_v56 = vsub.s32 0, %v2226_v54  ;;  %v2234_v60 = vsub.s32 1, %v2226_v54  ;;  %v2237_v61 = vsub.s32 2, %v2226_v54 }
   0x6   :  { %1911 = vmatprep.subr.bf16.mxu1 %v1985_v0  ;;  %v1921_v20 = vpack.c.bf16 %v1669_v17, %v1668_v16  ;;  %v1670_v23 = vld [vmem:[%s2906_s0 + $0x70] sm:$0xff]  ;;  %v1671_v24 = vld [vmem:[%s2906_s0 + $0x78] sm:$0xff]  ;;  %v2073_v25 = vld [vmem:[%s2907_s1 + $0x8] sm:$0xff]  ;;  %v1918_v26 = vpack.c.bf16 %v1664_v22, %v1663_v21  ;;  %v2240_v62 = vsub.s32 3, %v2226_v54  ;;  %v2246_v1 = vsub.s32 5, %v2226_v54 }
   0x7   :  { %v1924_v27 = vpack.c.bf16 %v1671_v24, %v1670_v23  ;;  %v2090_v28 = vld [vmem:[%s2907_s1 + $0x10] sm:$0xff]  ;;  %v1675_v29 = vld [vmem:[%s2906_s0 + $0x80] sm:$0xff]  ;;  %v1676_v30 = vld [vmem:[%s2906_s0 + $0x88] sm:$0xff]  ;;  %v2249_v2 = vsub.s32 6, %v2226_v54  ;;  %v2252_v4 = vsub.s32 7, %v2226_v54  ;;  %vm943_vm9 = vcmp.le.s32.totalorder %v2226_v54, 0 }
   0x8   :  { %1907 = vmatpush3.bf16.msra.mxu0 %v1906_v12  ;;  %v1682_v31 = vld [vmem:[%s2906_s0 + $0xa0] sm:$0xff]  ;;  %v1683_v32 = vld [vmem:[%s2906_s0 + $0xa8] sm:$0xff]  ;;  %v1927_v33 = vpack.c.bf16 %v1676_v30, %v1675_v29  ;;  %v1677_v35 = vld [vmem:[%s2906_s0 + $0x90] sm:$0xff]  ;;  %vm1015_vm10 = vcmp.le.s32.totalorder %v2226_v54, 1  ;;  %vm1094_vm11 = vcmp.le.s32.totalorder %v2226_v54, 2  ;;  %vm1179_vm12 = vcmp.le.s32.totalorder %v2226_v54, 3 }
   0x9   :  { %1913 = vmatpush3.bf16.msra.mxu1 %v1912_v13  ;;  %1914 = vmatprep.subr.bf16.mxu0 %v1985_v0  ;;  %v1933_v34 = vpack.c.bf16 %v1683_v32, %v1682_v31  ;;  %v1678_v36 = vld [vmem:[%s2906_s0 + $0x98] sm:$0xff]  ;;  %v1684_v37 = vld [vmem:[%s2906_s0 + $0xb0] sm:$0xff]  ;;  %v1689_v41 = vld [vmem:[%s2906_s0 + $0xc0] sm:$0xff]  ;;  %vm1270_vm13 = vcmp.le.s32.totalorder %v2226_v54, 4  ;;  %vm1367_vm14 = vcmp.le.s32.totalorder %v2226_v54, 5  ;;  %vm1470_vm15 = vcmp.le.s32.totalorder %v2226_v54, 6 }
   0xa   :  { %1920 = vmatprep.subr.bf16.mxu1 %v1985_v0  ;;  %v1685_v38 = vld [vmem:[%s2906_s0 + $0xb8] sm:$0xff]  ;;  %v1930_v39 = vpack.c.bf16 %v1678_v36, %v1677_v35  ;;  %v1690_v42 = vld [vmem:[%s2906_s0 + $0xc8] sm:$0xff]  ;;  %v1696_v43 = vld [vmem:[%s2906_s0 + $0xe0] sm:$0xff] }
   0xb   :  { %1775 = vmatmul.mubr.msk.f32.vlgmr.msra.gmra.mrb[0].mxu0 %vm18_vm1, %v2050_v18  ;;  %v1936_v40 = vpack.c.bf16 %v1685_v38, %v1684_v37  ;;  %v1697_v44 = vld [vmem:[%s2906_s0 + $0xe8] sm:$0xff]  ;;  %v1939_v45 = vpack.c.bf16 %v1690_v42, %v1689_v41  ;;  %v1691_v47 = vld [vmem:[%s2906_s0 + $0xd0] sm:$0xff]  ;;  %v1692_v48 = vld [vmem:[%s2906_s0 + $0xd8] sm:$0xff] }
   0xc   :  { %1792 = vmatmul.mubr.msk.f32.vlgmr.msra.gmra.mrb[0].mxu1 %vm18_vm1, %v2050_v18  ;;  %1916 = vmatpush3.bf16.msra.mxu0 %v1915_v19  ;;  %v1945_v46 = vpack.c.bf16 %v1697_v44, %v1696_v43  ;;  %v1698_v49 = vld [vmem:[%s2906_s0 + $0xf0] sm:$0xff]  ;;  %v1699_v50 = vld [vmem:[%s2906_s0 + $0xf8] sm:$0xff]  ;;  %v1942_v51 = vpack.c.bf16 %v1692_v48, %v1691_v47 }
   0xd   :  { %1922 = vmatpush3.bf16.msra.mxu1 %v1921_v20  ;;  %1777 = vmatprep.mubr.msk.f32.mxu0 %vm1986_vm0, %v1987_v8  ;;  %v1948_v52 = vpack.c.bf16 %v1699_v50, %v1698_v49 }
   0xe   :  { %1794 = vmatprep.mubr.msk.f32.mxu1 %vm1986_vm0, %v1987_v8  ;;  %1917 = vmatprep.subr.bf16.mxu0 %v1985_v0 }
   0xf   :  { %1778 = vmatmul.mubr.msk.f32.gmra.mrb[2].mxu0 %vm18_vm1, %v2073_v25  ;;  %1923 = vmatprep.subr.bf16.mxu1 %v1985_v0 }
  0x10   :  { %1795 = vmatmul.mubr.msk.f32.gmra.mrb[2].mxu1 %vm18_vm1, %v2073_v25  ;;  %1780 = vmatprep.mubr.msk.f32.mxu0 %vm1986_vm0, %v1987_v8 }
  0x11   :  { %1797 = vmatprep.mubr.msk.f32.mxu1 %vm1986_vm0, %v1987_v8  ;;  %1919 = vmatpush3.bf16.msra.mxu0 %v1918_v26 }
  0x12   :  { %1925 = vmatpush3.bf16.msra.mxu1 %v1924_v27  ;;  %1926 = vmatprep.subr.bf16.mxu0 %v1985_v0 }
  0x13   :  { %1781 = vmatmul.mubr.msk.f32.gmra.mrb[4].mxu0 %vm18_vm1, %v2090_v28  ;;  %1932 = vmatprep.subr.bf16.mxu1 %v1985_v0 }
  0x14   :  { %1798 = vmatmul.mubr.msk.f32.gmra.mrb[4].mxu1 %vm18_vm1, %v2090_v28  ;;  %1808 = vmatprep.mubr.msk.f32.mxu0 %vm1986_vm0, %v1987_v8 }
  0x15   :  { %1825 = vmatprep.mubr.msk.f32.mxu1 %vm1986_vm0, %v1987_v8 }
  0x17   :  { %1809 = vmatmul.mubr.msk.f32.vlgmr.msra.gmra.mrb[6].mxu0 %vm18_vm1, %v2050_v18 }
  0x18   :  { %1826 = vmatmul.mubr.msk.f32.vlgmr.msra.gmra.mrb[6].mxu1 %vm18_vm1, %v2050_v18  ;;  %1928 = vmatpush3.bf16.msra.mxu0 %v1927_v33 }
  0x19   :  { %1934 = vmatpush3.bf16.msra.mxu1 %v1933_v34  ;;  %1811 = vmatprep.mubr.msk.f32.mxu0 %vm1986_vm0, %v1987_v8 }
  0x1a   :  { %1828 = vmatprep.mubr.msk.f32.mxu1 %vm1986_vm0, %v1987_v8  ;;  %1929 = vmatprep.subr.bf16.mxu0 %v1985_v0 }
  0x1b   :  { %1812 = vmatmul.mubr.msk.f32.gmra.mrb[8].mxu0 %vm18_vm1, %v2073_v25  ;;  %1935 = vmatprep.subr.bf16.mxu1 %v1985_v0 }
  0x1c   :  { %1829 = vmatmul.mubr.msk.f32.gmra.mrb[8].mxu1 %vm18_vm1, %v2073_v25  ;;  %1814 = vmatprep.mubr.msk.f32.mxu0 %vm1986_vm0, %v1987_v8 }
  0x1d   :  { %1831 = vmatprep.mubr.msk.f32.mxu1 %vm1986_vm0, %v1987_v8  ;;  %1931 = vmatpush3.bf16.msra.mxu0 %v1930_v39 }
  0x1e   :  { %1937 = vmatpush3.bf16.msra.mxu1 %v1936_v40  ;;  %1938 = vmatprep.subr.bf16.mxu0 %v1985_v0 }
  0x1f   :  { %1815 = vmatmul.mubr.msk.f32.gmra.mrb[10].mxu0 %vm18_vm1, %v2090_v28  ;;  %1944 = vmatprep.subr.bf16.mxu1 %v1985_v0 }
  0x20   :  { %1832 = vmatmul.mubr.msk.f32.gmra.mrb[10].mxu1 %vm18_vm1, %v2090_v28  ;;  %1842 = vmatprep.mubr.msk.f32.mxu0 %vm1986_vm0, %v1987_v8 }
  0x21   :  { %1859 = vmatprep.mubr.msk.f32.mxu1 %vm1986_vm0, %v1987_v8 }
  0x23   :  { %1843 = vmatmul.mubr.msk.f32.vlgmr.msra.gmra.mrb[12].mxu0 %vm18_vm1, %v2050_v18 }
  0x24   :  { %1860 = vmatmul.mubr.msk.f32.vlgmr.msra.gmra.mrb[12].mxu1 %vm18_vm1, %v2050_v18  ;;  %1940 = vmatpush3.bf16.msra.mxu0 %v1939_v45 }
  0x25   :  { %1946 = vmatpush3.bf16.msra.mxu1 %v1945_v46  ;;  %1845 = vmatprep.mubr.msk.f32.mxu0 %vm1986_vm0, %v1987_v8 }
  0x26   :  { %1862 = vmatprep.mubr.msk.f32.mxu1 %vm1986_vm0, %v1987_v8  ;;  %1941 = vmatprep.subr.bf16.mxu0 %v1985_v0 }
  0x27   :  { %1846 = vmatmul.mubr.msk.f32.gmra.mrb[14].mxu0 %vm18_vm1, %v2073_v25  ;;  %1947 = vmatprep.subr.bf16.mxu1 %v1985_v0  ;;  %v2243_v0 = vsub.s32 4, %v2226_v54 }
  0x28   :  { %1863 = vmatmul.mubr.msk.f32.gmra.mrb[14].mxu1 %vm18_vm1, %v2073_v25  ;;  %1848 = vmatprep.mubr.msk.f32.mxu0 %vm1986_vm0, %v1987_v8 }
  0x29   :  { %1865 = vmatprep.mubr.msk.f32.mxu1 %vm1986_vm0, %v1987_v8  ;;  %1943 = vmatpush3.bf16.msra.mxu0 %v1942_v51 }
  0x2a   :  { %1949 = vmatpush3.bf16.msra.mxu1 %v1948_v52 }
  0x2b   :  { %1849 = vmatmul.mubr.msk.f32.gmra.mrb[16].mxu0 %vm18_vm1, %v2090_v28 }
  0x2c   :  { %1866 = vmatmul.mubr.msk.f32.gmra.mrb[16].mxu1 %vm18_vm1, %v2090_v28  ;;  %1876 = vmatprep.mubr.msk.f32.mxu0 %vm1986_vm0, %v1987_v8 }
  0x2d   :  { %1893 = vmatprep.mubr.msk.f32.mxu1 %vm1986_vm0, %v1987_v8 }
  0x2f   :  { %1877 = vmatmul.mubr.msk.f32.vlgmr.msra.gmra.mrb[18].mxu0 %vm18_vm1, %v2050_v18 }
  0x30   :  { %1894 = vmatmul.mubr.msk.f32.vlgmr.msra.gmra.mrb[18].mxu1 %vm18_vm1, %v2050_v18  ;;  %1879 = vmatprep.mubr.msk.f32.mxu0 %vm1986_vm0, %v1987_v8 }
  0x31   :  { %1896 = vmatprep.mubr.msk.f32.mxu1 %vm1986_vm0, %v1987_v8 }
  0x33   :  { %1880 = vmatmul.mubr.msk.f32.gmra.mrb[20].mxu0 %vm18_vm1, %v2073_v25 }
  0x34   :  { %1897 = vmatmul.mubr.msk.f32.gmra.mrb[20].mxu1 %vm18_vm1, %v2073_v25  ;;  %1882 = vmatprep.mubr.msk.f32.mxu0 %vm1986_vm0, %v1987_v8 }
  0x35   :  { %1899 = vmatprep.mubr.msk.f32.mxu1 %vm1986_vm0, %v1987_v8 }
  0x37   :  { %1883 = vmatmul.mubr.msk.f32.gmra.mrb[22].mxu0 %vm18_vm1, %v2090_v28 }
  0x38   :  { %1900 = vmatmul.mubr.msk.f32.gmra.mrb[22].mxu1 %vm18_vm1, %v2090_v28 }
  0xde   :  { %v94_v55 = vpop.f32.mrb[0].mxu0 }
  0xdf   :  { %v1776_v57 = vpop.f32.mrb[1].mxu0  ;;  %v180_v58 = vpop.f32.mrb[0].mxu1  ;;  %v2231_v59 = vmul.f32 0.35355338, %v94_v55 }
  0xe0   :  { %v1793_v63 = vpop.f32.mrb[1].mxu1  ;;  %v2254_v5 = vmul.f32 0.35355338, %v180_v58 }
  0xe1   :  { %v899_v8 = vrot.slane %v2231_v59, %v2229_v56  ;;  %v904_v9 = vrot.slane %v2231_v59, %v2234_v60  ;;  %v910_v10 = vrot.slane %v2231_v59, %v2237_v61  ;;  %v916_v11 = vrot.slane %v2231_v59, %v2240_v62 }
  0xe2   :  { %v99_v3 = vpop.f32.mrb[2].mxu0  ;;  %v922_v33 = vrot.slane %v2231_v59, %v2243_v0  ;;  %v928_v37 = vrot.slane %v2231_v59, %v2246_v1  ;;  %v934_v42 = vrot.slane %v2231_v59, %v2249_v2  ;;  %v940_v43 = vrot.slane %v2231_v59, %v2252_v4 }
  0xe3   :  { %v185_v6 = vpop.f32.mrb[2].mxu1  ;;  %v1779_v7 = vpop.f32.mrb[3].mxu0  ;;  %v747_v13 = vrot.slane %v99_v3, 1  ;;  %v768_v14 = vrot.slane %v99_v3, 2  ;;  %v789_v15 = vrot.slane %v99_v3, 3  ;;  %v810_v16 = vrot.slane %v99_v3, 4 }
  0xe4   :  { %v1796_v12 = vpop.f32.mrb[3].mxu1  ;;  %v831_v17 = vrot.slane %v99_v3, 5  ;;  %v852_v18 = vrot.slane %v99_v3, 6  ;;  %v873_v19 = vrot.slane %v99_v3, 7  ;;  %v712_v20 = vrot.slane %v185_v6, 7 }
  0xe5   :  { %v2267_v22 = vsel %vm732_vm2, %v747_v13, %v185_v6  ;;  %v770_v23 = vrot.slane %v185_v6, 1  ;;  %v791_v24 = vrot.slane %v185_v6, 2  ;;  %v812_v25 = vrot.slane %v185_v6, 3 }
  0xe6   :  { %v2264_v21 = vpop.f32.mrb[4].mxu0  ;;  %v733_v28 = vsel %vm732_vm2, %v99_v3, %v712_v20  ;;  %v833_v29 = vrot.slane %v185_v6, 4  ;;  %v854_v30 = vrot.slane %v185_v6, 5  ;;  %v875_v31 = vrot.slane %v185_v6, 6 }
  0xe7   :  { %v1782_v26 = vpop.f32.mrb[5].mxu0  ;;  %v2269_v27 = vpop.f32.mrb[4].mxu1  ;;  %v2275_v34 = vsel %vm732_vm2, %v810_v16, %v812_v25  ;;  %v782_v35 = vsel %vm732_vm2, %v768_v14, %v770_v23  ;;  %v803_v36 = vsel %vm732_vm2, %v789_v15, %v791_v24  ;;  %v971_v44 = vrot.slane %v2254_v5, %v2229_v56 }
  0xe8   :  { %v1799_v32 = vpop.f32.mrb[5].mxu1  ;;  %v845_v38 = vsel %vm732_vm2, %v831_v17, %v833_v29  ;;  %v866_v39 = vsel %vm732_vm2, %v852_v18, %v854_v30  ;;  %v887_v40 = vsel %vm732_vm2, %v873_v19, %v875_v31  ;;  %v2911_v59 = vrot.slane %v2254_v5, %v2240_v62 }
  0xea   :  { %v266_v41 = vpop.f32.mrb[6].mxu0 }
  0xeb   :  { %v2290_v45 = vmul.f32 0.35355338, %v266_v41  ;;  %v1810_v46 = vpop.f32.mrb[7].mxu0  ;;  %v352_v47 = vpop.f32.mrb[6].mxu1 }
  0xec   :  { %v2298_v51 = vmul.f32 0.35355338, %v352_v47  ;;  %v1827_v52 = vpop.f32.mrb[7].mxu1 }
  0xee   :  { %v271_v12 = vpop.f32.mrb[8].mxu0 }
  0xef   :  { %v357_v17 = vpop.f32.mrb[8].mxu1  ;;  %v1813_v18 = vpop.f32.mrb[9].mxu0  ;;  %v715_v26 = vrot.slane %v271_v12, 6  ;;  %v749_v29 = vrot.slane %v271_v12, 7  ;;  %v783_v30 = vsel %vm734_vm3, %v782_v35, %v271_v12  ;;  %v793_v31 = vrot.slane %v271_v12, 1 }
  0xf0   :  { %v1830_v25 = vpop.f32.mrb[9].mxu1  ;;  %v814_v32 = vrot.slane %v271_v12, 2  ;;  %v835_v41 = vrot.slane %v271_v12, 3  ;;  %v856_v46 = vrot.slane %v271_v12, 4  ;;  %v877_v47 = vrot.slane %v271_v12, 5 }
  0xf1   :  { %v735_v18 = vsel %vm734_vm3, %v733_v28, %v715_v26  ;;  %v762_v23 = vsel %vm734_vm3, %v2267_v22, %v749_v29  ;;  %v718_v20 = vrot.slane %v357_v17, 5  ;;  %v751_v19 = vrot.slane %v357_v17, 6 }
  0xf2   :  { %v2333_v52 = vpop.f32.mrb[10].mxu0  ;;  %v846_v35 = vsel %vm734_vm3, %v845_v38, %v835_v41  ;;  %v867_v16 = vsel %vm734_vm3, %v866_v39, %v856_v46  ;;  %v888_v15 = vsel %vm734_vm3, %v887_v40, %v877_v47  ;;  %v772_v12 = vrot.slane %v357_v17, 7 }
  0xf3   :  { %v1816_v24 = vpop.f32.mrb[11].mxu0  ;;  %v2338_v25 = vpop.f32.mrb[10].mxu1  ;;  %v737_v13 = vsel %vm736_vm4, %v735_v18, %v718_v20  ;;  %v763_v28 = vsel %vm736_vm4, %v762_v23, %v751_v19  ;;  %v804_v22 = vsel %vm734_vm3, %v803_v36, %v793_v31  ;;  %v816_v26 = vrot.slane %v357_v17, 1 }
  0xf4   :  { %v1833_v14 = vpop.f32.mrb[11].mxu1  ;;  %v784_v24 = vsel %vm736_vm4, %v783_v30, %v772_v12  ;;  %v805_v29 = vsel %vm736_vm4, %v804_v22, %v357_v17  ;;  %v837_v7 = vrot.slane %v357_v17, 2  ;;  %v858_v6 = vrot.slane %v357_v17, 3 }
  0xf5   :  { %v879_v40 = vrot.slane %v357_v17, 4  ;;  %v825_v19 = vsel %vm734_vm3, %v2275_v34, %v814_v32 }
  0xf6   :  { %v438_v38 = vpop.f32.mrb[12].mxu0  ;;  %v2355_v36 = vsel %vm736_vm4, %v867_v16, %v858_v6  ;;  %v826_v31 = vsel %vm736_vm4, %v825_v19, %v816_v26  ;;  %v847_v46 = vsel %vm736_vm4, %v846_v35, %v837_v7 }
  0xf7   :  { %v2350_v41 = vmul.f32 0.35355338, %v438_v38  ;;  %v1844_v14 = vpop.f32.mrb[13].mxu0  ;;  %v524_v20 = vpop.f32.mrb[12].mxu1  ;;  %v889_v32 = vsel %vm736_vm4, %v888_v15, %v879_v40 }
  0xf8   :  { %v2357_v23 = vmul.f32 0.35355338, %v524_v20  ;;  %v1861_v30 = vpop.f32.mrb[13].mxu1 }
  0xfa   :  { %v443_v35 = vpop.f32.mrb[14].mxu0 }
  0xfb   :  { %v529_v38 = vpop.f32.mrb[14].mxu1  ;;  %v1847_v40 = vpop.f32.mrb[15].mxu0  ;;  %v721_v12 = vrot.slane %v443_v35, 4  ;;  %v753_v26 = vrot.slane %v443_v35, 5  ;;  %v774_v18 = vrot.slane %v443_v35, 6  ;;  %v827_v7 = vsel %vm738_vm5, %v826_v31, %v443_v35 }
  0xfc   :  { %v1864_v22 = vpop.f32.mrb[15].mxu1  ;;  %v795_v40 = vrot.slane %v443_v35, 7  ;;  %v839_v14 = vrot.slane %v443_v35, 1  ;;  %v860_v16 = vrot.slane %v443_v35, 2  ;;  %v724_v17 = vrot.slane %v529_v38, 3 }
  0xfd   :  { %v739_v20 = vsel %vm738_vm5, %v737_v13, %v721_v12  ;;  %v764_v19 = vsel %vm738_vm5, %v763_v28, %v753_v26  ;;  %v785_v30 = vsel %vm738_vm5, %v784_v24, %v774_v18  ;;  %v881_v22 = vrot.slane %v443_v35, 3 }
  0xfe   :  { %v2395_v6 = vpop.f32.mrb[16].mxu0  ;;  %v806_v15 = vsel %vm738_vm5, %v805_v29, %v795_v40  ;;  %v755_v39 = vrot.slane %v529_v38, 4  ;;  %v776_v3 = vrot.slane %v529_v38, 5  ;;  %v797_v58 = vrot.slane %v529_v38, 6 }
  0xff   :  { %v1850_v34 = vpop.f32.mrb[17].mxu0  ;;  %v2400_v47 = vpop.f32.mrb[16].mxu1  ;;  %v890_v63 = vsel %vm738_vm5, %v889_v32, %v881_v22  ;;  %v818_v57 = vrot.slane %v529_v38, 7  ;;  %v848_v13 = vsel %vm738_vm5, %v847_v46, %v839_v14  ;;  %v741_v28 = vsel %vm740_vm6, %v739_v20, %v724_v17 }
 0x100   :  { %v1867_v31 = vpop.f32.mrb[17].mxu1  ;;  %v765_v24 = vsel %vm740_vm6, %v764_v19, %v755_v39  ;;  %v786_v34 = vsel %vm740_vm6, %v785_v30, %v776_v3  ;;  %v849_v18 = vsel %vm740_vm6, %v848_v13, %v529_v38  ;;  %v807_v35 = vsel %vm740_vm6, %v806_v15, %v797_v58 }
 0x101   :  { %v828_v12 = vsel %vm740_vm6, %v827_v7, %v818_v57  ;;  %v862_v26 = vrot.slane %v529_v38, 1  ;;  %v883_v40 = vrot.slane %v529_v38, 2  ;;  %v869_v3 = vsel %vm738_vm5, %v2355_v36, %v860_v16 }
 0x102   :  { %v610_v29 = vpop.f32.mrb[18].mxu0 }
 0x103   :  { %v1878_v32 = vpop.f32.mrb[19].mxu0  ;;  %v696_v22 = vpop.f32.mrb[18].mxu1  ;;  %v2413_v14 = vmul.f32 0.35355338, %v610_v29  ;;  %v870_v7 = vsel %vm740_vm6, %v869_v3, %v862_v26  ;;  %v891_v15 = vsel %vm740_vm6, %v890_v63, %v883_v40 }
 0x104   :  { %v2415_v17 = vmul.f32 0.35355338, %v696_v22  ;;  %v1895_v39 = vpop.f32.mrb[19].mxu1 }
 0x106   :  { %v615_v19 = vpop.f32.mrb[20].mxu0 }
 0x107   :  { %v701_v29 = vpop.f32.mrb[20].mxu1  ;;  %v1881_v26 = vpop.f32.mrb[21].mxu0  ;;  %v727_v32 = vrot.slane %v615_v19, 2  ;;  %v757_v31 = vrot.slane %v615_v19, 3  ;;  %v778_v30 = vrot.slane %v615_v19, 4  ;;  %v799_v22 = vrot.slane %v615_v19, 5 }
 0x108   :  { %v1898_v3 = vpop.f32.mrb[21].mxu1  ;;  %v820_v39 = vrot.slane %v615_v19, 6  ;;  %v871_v36 = vsel %vm742_vm7, %v870_v7, %v615_v19  ;;  %v885_v63 = vrot.slane %v615_v19, 1  ;;  %v730_v53 = vrot.slane %v701_v29, 1 }
 0x109   :  { %v841_v3 = vrot.slane %v615_v19, 7  ;;  %v743_v38 = vsel %vm742_vm7, %v741_v28, %v727_v32  ;;  %v766_v26 = vsel %vm742_vm7, %v765_v24, %v757_v31  ;;  %v787_v40 = vsel %vm742_vm7, %v786_v34, %v778_v30 }
 0x10a   :  { %v2457_v16 = vpop.f32.mrb[22].mxu0  ;;  %v808_v57 = vsel %vm742_vm7, %v807_v35, %v799_v22  ;;  %v829_v46 = vsel %vm742_vm7, %v828_v12, %v820_v39  ;;  %v759_v50 = vrot.slane %v701_v29, 2  ;;  %v780_v7 = vrot.slane %v701_v29, 3 }
 0x10b   :  { %v2460_v20 = vpop.f32.mrb[22].mxu1  ;;  %v1884_v13 = vpop.f32.mrb[23].mxu0  ;;  %v850_v55 = vsel %vm742_vm7, %v849_v18, %v841_v3  ;;  %v801_v19 = vrot.slane %v701_v29, 4  ;;  %v822_v49 = vrot.slane %v701_v29, 5  ;;  %v843_v48 = vrot.slane %v701_v29, 6 }
 0x10c   :  { %v1901_v58 = vpop.f32.mrb[23].mxu1  ;;  %v2469_v13 = vsel %vm744_vm8, %v743_v38, %v730_v53  ;;  %v2472_v28 = vsel %vm744_vm8, %v766_v26, %v759_v50  ;;  %v864_v24 = vrot.slane %v701_v29, 7  ;;  %v892_v34 = vsel %vm742_vm7, %v891_v15, %v885_v63 }
 0x10d   :  { %v2476_v35 = vsel %vm744_vm8, %v787_v40, %v780_v7  ;;  %v2479_v18 = vsel %vm744_vm8, %v808_v57, %v801_v19  ;;  %v2482_v12 = vsel %vm744_vm8, %v829_v46, %v822_v49  ;;  %v2485_v58 = vsel %vm744_vm8, %v850_v55, %v843_v48 }
 0x10e   :  { %v2488_v53 = vsel %vm744_vm8, %v871_v36, %v864_v24  ;;  %v2491_v50 = vsel %vm744_vm8, %v892_v34, %v701_v29  ;;  %v900_v15 = vmul.f32 %v899_v8, %v2469_v13  ;;  %v905_v49 = vmul.f32 %v904_v9, %v2472_v28 }
 0x10f   :  { %v911_v48 = vmul.f32 %v910_v10, %v2476_v35  ;;  %v917_v55 = vmul.f32 %v916_v11, %v2479_v18  ;;  %v923_v8 = vmul.f32 %v922_v33, %v2482_v12  ;;  %v929_v9 = vmul.f32 %v928_v37, %v2485_v58 }
 0x110   :  { %v906_v46 = vadd.f32 %v905_v49, %v900_v15  ;;  %v935_v10 = vmul.f32 %v934_v42, %v2488_v53  ;;  %v941_v11 = vmul.f32 %v940_v43, %v2491_v50  ;;  %v972_v33 = vmul.f32 %v971_v44, %v2469_v13 }
 0x111   :  { %v2909_v37 = vrot.slane %v2254_v5, %v2234_v60  ;;  %v2910_v38 = vrot.slane %v2254_v5, %v2237_v61  ;;  %v989_v43 = vmul.f32 %v2911_v59, %v2479_v18  ;;  %v2912_v36 = vrot.slane %v2254_v5, %v2243_v0 }
 0x112   :  { %v912_v30 = vadd.f32 %v911_v48, %v906_v46  ;;  %v2913_v31 = vrot.slane %v2254_v5, %v2246_v1  ;;  %v2914_v29 = vrot.slane %v2254_v5, %v2249_v2  ;;  %v2915_v32 = vrot.slane %v2254_v5, %v2252_v4 }
 0x113   :  { %v977_v57 = vmul.f32 %v2909_v37, %v2472_v28  ;;  %v983_v42 = vmul.f32 %v2910_v38, %v2476_v35  ;;  %v995_v44 = vmul.f32 %v2912_v36, %v2482_v12  ;;  %v2916_v26 = vrot.slane %v2290_v45, %v2229_v56 }
 0x114   :  { %v1001_v63 = vmul.f32 %v2913_v31, %v2485_v58  ;;  %v1007_v40 = vmul.f32 %v2914_v29, %v2488_v53  ;;  %v1013_v22 = vmul.f32 %v2915_v32, %v2491_v50  ;;  %v2917_v7 = vrot.slane %v2290_v45, %v2234_v60 }
 0x115   :  { %v978_v39 = vadd.f32 %v977_v57, %v972_v33  ;;  %v1051_v3 = vmul.f32 %v2916_v26, %v2469_v13  ;;  %v2918_v24 = vrot.slane %v2290_v45, %v2237_v61  ;;  %v918_v5 = vadd.f32 %v917_v55, %v912_v30 }
 0x116   :  { %v1056_v19 = vmul.f32 %v2917_v7, %v2472_v28  ;;  %v2919_v15 = vrot.slane %v2290_v45, %v2240_v62  ;;  %v2920_v48 = vrot.slane %v2290_v45, %v2243_v0  ;;  %v2921_v33 = vrot.slane %v2290_v45, %v2246_v1 }
 0x117   :  { %v1062_v34 = vmul.f32 %v2918_v24, %v2476_v35  ;;  %v984_v57 = vadd.f32 %v983_v42, %v978_v39  ;;  %v2922_v55 = vrot.slane %v2290_v45, %v2249_v2  ;;  %v2923_v36 = vrot.slane %v2290_v45, %v2252_v4 }
 0x118   :  { %v1068_v49 = vmul.f32 %v2919_v15, %v2479_v18  ;;  %v1074_v46 = vmul.f32 %v2920_v48, %v2482_v12  ;;  %v1080_v37 = vmul.f32 %v2921_v33, %v2485_v58  ;;  %v1057_v38 = vadd.f32 %v1056_v19, %v1051_v3 }
 0x119   :  { %v1086_v59 = vmul.f32 %v2922_v55, %v2488_v53  ;;  %v1092_v30 = vmul.f32 %v2923_v36, %v2491_v50  ;;  %v924_v31 = vadd.f32 %v923_v8, %v918_v5  ;;  %v2924_v29 = vrot.slane %v2298_v51, %v2229_v56 }
 0x11a   :  { %v2925_v42 = vrot.slane %v2298_v51, %v2234_v60  ;;  %v2926_v26 = vrot.slane %v2298_v51, %v2237_v61  ;;  %v990_v45 = vadd.f32 %v989_v43, %v984_v57  ;;  %v1063_v7 = vadd.f32 %v1062_v34, %v1057_v38 }
 0x11b   :  { %v1136_v32 = vmul.f32 %v2924_v29, %v2469_v13  ;;  %v2927_v8 = vrot.slane %v2298_v51, %v2240_v62  ;;  %v2928_v24 = vrot.slane %v2298_v51, %v2243_v0  ;;  %v930_v15 = vadd.f32 %v929_v9, %v924_v31 }
 0x11c   :  { %v1141_v39 = vmul.f32 %v2925_v42, %v2472_v28  ;;  %v1147_v3 = vmul.f32 %v2926_v26, %v2476_v35  ;;  %v2929_v33 = vrot.slane %v2298_v51, %v2246_v1  ;;  %v2930_v34 = vrot.slane %v2298_v51, %v2249_v2 }
 0x11d   :  { %v1153_v19 = vmul.f32 %v2927_v8, %v2479_v18  ;;  %v1159_v5 = vmul.f32 %v2928_v24, %v2482_v12  ;;  %v996_v38 = vadd.f32 %v995_v44, %v990_v45  ;;  %v1069_v55 = vadd.f32 %v1068_v49, %v1063_v7 }
 0x11e   :  { %v1142_v48 = vadd.f32 %v1141_v39, %v1136_v32  ;;  %v1165_v43 = vmul.f32 %v2929_v33, %v2485_v58  ;;  %v1171_v57 = vmul.f32 %v2930_v34, %v2488_v53  ;;  %v2931_v36 = vrot.slane %v2298_v51, %v2252_v4 }
 0x11f   :  { %v2932_v31 = vrot.slane %v2350_v41, %v2229_v56  ;;  %v936_v32 = vadd.f32 %v935_v10, %v930_v15  ;;  %v2933_v39 = vrot.slane %v2350_v41, %v2234_v60  ;;  %v2934_v44 = vrot.slane %v2350_v41, %v2237_v61 }
 0x120   :  { %v1177_v9 = vmul.f32 %v2931_v36, %v2491_v50  ;;  %v1148_v42 = vadd.f32 %v1147_v3, %v1142_v48  ;;  %v1002_v45 = vadd.f32 %v1001_v63, %v996_v38  ;;  %v1075_v51 = vadd.f32 %v1074_v46, %v1069_v55 }
 0x121   :  { %v1227_v29 = vmul.f32 %v2932_v31, %v2469_v13  ;;  %v1232_v26 = vmul.f32 %v2933_v39, %v2472_v28  ;;  %v1238_v49 = vmul.f32 %v2934_v44, %v2476_v35  ;;  %v2935_v7 = vrot.slane %v2350_v41, %v2240_v62 }
 0x122   :  { %v2936_v3 = vrot.slane %v2350_v41, %v2243_v0  ;;  %v942_v24 = vadd.f32 %v941_v11, %v936_v32  ;;  %v1154_v15 = vadd.f32 %v1153_v19, %v1148_v42  ;;  %v2937_v63 = vrot.slane %v2350_v41, %v2246_v1 }
 0x123   :  { %v1244_v10 = vmul.f32 %v2935_v7, %v2479_v18  ;;  %v1233_v48 = vadd.f32 %v1232_v26, %v1227_v29  ;;  %v1008_v33 = vadd.f32 %v1007_v40, %v1002_v45  ;;  %v1081_v34 = vadd.f32 %v1080_v37, %v1075_v51 }
 0x124   :  { %v1250_v8 = vmul.f32 %v2936_v3, %v2482_v12  ;;  %v1256_v46 = vmul.f32 %v2937_v63, %v2485_v58  ;;  %v2938_v38 = vrot.slane %v2350_v41, %v2249_v2  ;;  %v2939_v36 = vrot.slane %v2350_v41, %v2252_v4 }
 0x125   :  { %v944_v11 = vsel %vm943_vm9, %v942_v24, -1e+30  ;;  %v1160_v19 = vadd.f32 %v1159_v5, %v1154_v15  ;;  %v1239_v29 = vadd.f32 %v1238_v49, %v1233_v48  ;;  %v2940_v40 = vrot.slane %v2357_v23, %v2229_v56 }
 0x126   :  { %v1262_v55 = vmul.f32 %v2938_v38, %v2488_v53  ;;  %v1268_v31 = vmul.f32 %v2939_v36, %v2491_v50  ;;  %v945_v32 = vrot.slane %v944_v11, 4  ;;  %v1014_v42 = vadd.f32 %v1013_v22, %v1008_v33 }
 0x127   :  { %v1324_v37 = vmul.f32 %v2940_v40, %v2469_v13  ;;  %v1087_v39 = vadd.f32 %v1086_v59, %v1081_v34  ;;  %v2941_v41 = vrot.slane %v2357_v23, %v2234_v60  ;;  %v1166_v44 = vadd.f32 %v1165_v43, %v1160_v19 }
 0x128   :  { %v1245_v45 = vadd.f32 %v1244_v10, %v1239_v29  ;;  %v2942_v5 = vrot.slane %v2357_v23, %v2237_v61  ;;  %v2943_v51 = vrot.slane %v2357_v23, %v2240_v62  ;;  %v946_v59 = vmax.f32 %v944_v11, %v945_v32 }
 0x129   :  { %v1329_v26 = vmul.f32 %v2941_v41, %v2472_v28  ;;  %v1016_v7 = vsel %vm1015_vm10, %v1014_v42, -1e+30  ;;  %v1093_v3 = vadd.f32 %v1092_v30, %v1087_v39  ;;  %v1172_v48 = vadd.f32 %v1171_v57, %v1166_v44 }
 0x12a   :  { %v1335_v49 = vmul.f32 %v2942_v5, %v2476_v35  ;;  %v1341_v22 = vmul.f32 %v2943_v51, %v2479_v18  ;;  %v1017_v15 = vrot.slane %v1016_v7, 4  ;;  %v1251_v43 = vadd.f32 %v1250_v8, %v1245_v45 }
 0x12b   :  { %v1330_v24 = vadd.f32 %v1329_v26, %v1324_v37  ;;  %v2944_v10 = vrot.slane %v2357_v23, %v2243_v0  ;;  %v947_v33 = vrot.slane %v946_v59, 2  ;;  %v1095_v34 = vsel %vm1094_vm11, %v1093_v3, -1e+30 }
 0x12c   :  { %v2945_v36 = vrot.slane %v2357_v23, %v2246_v1  ;;  %v1018_v30 = vmax.f32 %v1016_v7, %v1017_v15  ;;  %v1096_v29 = vrot.slane %v1095_v34, 4  ;;  %v1178_v40 = vadd.f32 %v1177_v9, %v1172_v48 }
 0x12d   :  { %v1347_v63 = vmul.f32 %v2944_v10, %v2482_v12  ;;  %v1336_v38 = vadd.f32 %v1335_v49, %v1330_v24  ;;  %v1257_v57 = vadd.f32 %v1256_v46, %v1251_v43  ;;  %v948_v8 = vmax.f32 %v946_v59, %v947_v33 }
 0x12e   :  { %v1353_v19 = vmul.f32 %v2945_v36, %v2485_v58  ;;  %v2946_v32 = vrot.slane %v2357_v23, %v2249_v2  ;;  %v2947_v39 = vrot.slane %v2357_v23, %v2252_v4  ;;  %v1019_v26 = vrot.slane %v1018_v30, 2 }
 0x12f   :  { %v1342_v37 = vadd.f32 %v1341_v22, %v1336_v38  ;;  %v1097_v44 = vmax.f32 %v1095_v34, %v1096_v29  ;;  %v1180_v9 = vsel %vm1179_vm12, %v1178_v40, -1e+30  ;;  %v1263_v46 = vadd.f32 %v1262_v55, %v1257_v57 }
 0x130   :  { %v1359_v42 = vmul.f32 %v2946_v32, %v2488_v53  ;;  %v1365_v41 = vmul.f32 %v2947_v39, %v2491_v50  ;;  %v949_v45 = vrot.slane %v948_v8, 1  ;;  %v1181_v5 = vrot.slane %v1180_v9, 4 }
 0x131   :  { %v1348_v49 = vadd.f32 %v1347_v63, %v1342_v37  ;;  %v2948_v51 = vrot.slane %v2413_v14, %v2229_v56  ;;  %v1020_v59 = vmax.f32 %v1018_v30, %v1019_v26  ;;  %v1098_v3 = vrot.slane %v1097_v44, 2 }
 0x132   :  { %v1269_v24 = vadd.f32 %v1268_v31, %v1263_v46  ;;  %v2949_v23 = vrot.slane %v2413_v14, %v2234_v60  ;;  %v950_v48 = vmax.f32 %v948_v8, %v949_v45  ;;  %v1182_v43 = vmax.f32 %v1180_v9, %v1181_v5 }
 0x133   :  { %v1427_v22 = vmul.f32 %v2948_v51, %v2469_v13  ;;  %v1354_v10 = vadd.f32 %v1353_v19, %v1348_v49  ;;  %v2950_v55 = vrot.slane %v2413_v14, %v2237_v61  ;;  %v1021_v33 = vrot.slane %v1020_v59, 1 }
 0x134   :  { %v1432_v15 = vmul.f32 %v2949_v23, %v2472_v28  ;;  %v1099_v38 = vmax.f32 %v1097_v44, %v1098_v3  ;;  %v1271_v36 = vsel %vm1270_vm13, %v1269_v24, -1e+30  ;;  %v951_v31 = vsub.f32 %v944_v11, %v950_v48 }
 0x135   :  { %v1438_v63 = vmul.f32 %v2950_v55, %v2476_v35  ;;  %v1183_v29 = vrot.slane %v1182_v43, 2  ;;  %v1272_v40 = vrot.slane %v1271_v36, 4  ;;  %v1360_v57 = vadd.f32 %v1359_v42, %v1354_v10 }
 0x136   :  { %v1433_v30 = vadd.f32 %v1432_v15, %v1427_v22  ;;  %v1022_v37 = vmax.f32 %v1020_v59, %v1021_v33  ;;  %v1100_v32 = vrot.slane %v1099_v38, 1  ;;  %v2951_v19 = vrot.slane %v2413_v14, %v2240_v62 }
 0x137   :  { %v952_v26 = vmul.f32 1.442695, %v951_v31  ;;  %v1184_v46 = vmax.f32 %v1182_v43, %v1183_v29  ;;  %v1273_v45 = vmax.f32 %v1271_v36, %v1272_v40  ;;  %v1366_v44 = vadd.f32 %v1365_v41, %v1360_v57 }
 0x138   :  { %v1439_v8 = vadd.f32 %v1438_v63, %v1433_v30  ;;  %v1444_v39 = vmul.f32 %v2951_v19, %v2479_v18  ;;  %v1023_v5 = vsub.f32 %v1016_v7, %v1022_v37  ;;  %v1101_v49 = vmax.f32 %v1099_v38, %v1100_v32 }
 0x139   :  { %v2952_v11 = vrot.slane %v2413_v14, %v2243_v0  ;;  %1953 = vpow2.f32 %v952_v26  ;;  %v1185_v22 = vrot.slane %v1184_v46, 1  ;;  %v1274_v59 = vrot.slane %v1273_v45, 2 }
 0x13a   :  { %v1445_v51 = vadd.f32 %v1444_v39, %v1439_v8  ;;  %v1368_v3 = vsel %vm1367_vm14, %v1366_v44, -1e+30  ;;  %v1024_v24 = vmul.f32 1.442695, %v1023_v5  ;;  %v1102_v23 = vsub.f32 %v1095_v34, %v1101_v49 }
 0x13b   :  { %v1450_v42 = vmul.f32 %v2952_v11, %v2482_v12  ;;  %v1369_v15 = vrot.slane %v1368_v3, 4  ;;  %v1186_v7 = vmax.f32 %v1184_v46, %v1185_v22  ;;  %v1275_v48 = vmax.f32 %v1273_v45, %v1274_v59 }
 0x13c   :  { %v2953_v43 = vrot.slane %v2413_v14, %v2246_v1  ;;  %v2954_v55 = vrot.slane %v2413_v14, %v2249_v2  ;;  %1955 = vpow2.f32 %v1024_v24  ;;  %v1103_v33 = vmul.f32 1.442695, %v1102_v23 }
 0x13d   :  { %v1451_v41 = vadd.f32 %v1450_v42, %v1445_v51  ;;  %v1370_v38 = vmax.f32 %v1368_v3, %v1369_v15  ;;  %v2955_v34 = vrot.slane %v2413_v14, %v2252_v4  ;;  %v1187_v31 = vsub.f32 %v1180_v9, %v1186_v7 }
 0x13e   :  { %v1456_v10 = vmul.f32 %v2953_v43, %v2485_v58  ;;  %v1462_v63 = vmul.f32 %v2954_v55, %v2488_v53  ;;  %v1276_v29 = vrot.slane %v1275_v48, 1  ;;  %v2956_v57 = vrot.slane %v2415_v17, %v2229_v56 }
 0x13f   :  { %v1468_v30 = vmul.f32 %v2955_v34, %v2491_v50  ;;  %1957 = vpow2.f32 %v1103_v33  ;;  %v1371_v32 = vrot.slane %v1370_v38, 2  ;;  %v2957_v8 = vrot.slane %v2415_v17, %v2234_v60 }
 0x140   :  { %v1457_v40 = vadd.f32 %v1456_v10, %v1451_v41  ;;  %v1536_v37 = vmul.f32 %v2956_v57, %v2469_v13  ;;  %v2958_v14 = vrot.slane %v2415_v17, %v2237_v61  ;;  %v1188_v9 = vmul.f32 1.442695, %v1187_v31 }
 0x141   :  { %v1541_v19 = vmul.f32 %v2957_v8, %v2472_v28  ;;  %v1277_v26 = vmax.f32 %v1275_v48, %v1276_v29  ;;  %v2959_v45 = vrot.slane %v2415_v17, %v2240_v62  ;;  %v1372_v44 = vmax.f32 %v1370_v38, %v1371_v32 }
 0x142   :  { %v1547_v39 = vmul.f32 %v2958_v14, %v2476_v35  ;;  %v1463_v46 = vadd.f32 %v1462_v63, %v1457_v40  ;;  %v2960_v49 = vrot.slane %v2415_v17, %v2243_v0  ;;  %v2961_v51 = vrot.slane %v2415_v17, %v2246_v1 }
 0x143   :  { %v1553_v13 = vmul.f32 %v2959_v45, %v2479_v18  ;;  %v1542_v5 = vadd.f32 %v1541_v19, %v1536_v37  ;;  %1959 = vpow2.f32 %v1188_v9  ;;  %v1278_v11 = vsub.f32 %v1271_v36, %v1277_v26  ;;  %v2768_v15 = vpop.eup %1953 }
 0x144   :  { %v1559_v28 = vmul.f32 %v2960_v49, %v2482_v12  ;;  %v1565_v35 = vmul.f32 %v2961_v51, %v2485_v58  ;;  %v1469_v42 = vadd.f32 %v1468_v30, %v1463_v46  ;;  %v2962_v22 = vrot.slane %v2415_v17, %v2249_v2 }
 0x145   :  { %v1373_v59 = vrot.slane %v1372_v44, 1  ;;  %v1548_v24 = vadd.f32 %v1547_v39, %v1542_v5  ;;  %v2963_v23 = vrot.slane %v2415_v17, %v2252_v4  ;;  %v1279_v41 = vmul.f32 1.442695, %v1278_v11 }
 0x146   :  { %v1571_v18 = vmul.f32 %v2962_v22, %v2488_v53  ;;  %v1471_v58 = vsel %vm1470_vm15, %v1469_v42, -1e+30  ;;  %v954_v43 = vrot.slane %v2768_v15, 4  ;;  %v2773_v53 = vpop.eup %1955 }
 0x147   :  { %v1577_v12 = vmul.f32 %v2963_v23, %v2491_v50  ;;  %v1374_v36 = vmax.f32 %v1372_v44, %v1373_v59  ;;  %v1472_v7 = vrot.slane %v1471_v58, 4  ;;  %v1554_v48 = vadd.f32 %v1553_v13, %v1548_v24 }
 0x148   :  { %1961 = vpow2.f32 %v1279_v41  ;;  %v955_v17 = vadd.f32 %v2768_v15, %v954_v43  ;;  %v1026_v50 = vrot.slane %v2773_v53, 4 }
 0x149   :  { %v1375_v10 = vsub.f32 %v1368_v3, %v1374_v36  ;;  %v1473_v55 = vmax.f32 %v1471_v58, %v1472_v7  ;;  %v1560_v63 = vadd.f32 %v1559_v28, %v1554_v48  ;;  %v2777_v33 = vpop.eup %1957 }
 0x14a   :  { %v956_v30 = vrot.slane %v955_v17, 2  ;;  %v1027_v31 = vadd.f32 %v2773_v53, %v1026_v50  ;;  %v1105_v29 = vrot.slane %v2777_v33, 4 }
 0x14b   :  { %v1376_v38 = vmul.f32 1.442695, %v1375_v10  ;;  %v1474_v54 = vrot.slane %v1473_v55, 2  ;;  %v1566_v34 = vadd.f32 %v1565_v35, %v1560_v63 }
 0x14c   :  { %v957_v3 = vadd.f32 %v956_v30, %v955_v17  ;;  %v1028_v32 = vrot.slane %v1027_v31, 2  ;;  %v1106_v8 = vadd.f32 %v2777_v33, %v1105_v29 }
 0x14d   :  { %1963 = vpow2.f32 %v1376_v38  ;;  %v1475_v40 = vmax.f32 %v1473_v55, %v1474_v54  ;;  %v1572_v57 = vadd.f32 %v1571_v18, %v1566_v34  ;;  %v2781_v37 = vpop.eup %1959 }
 0x14e   :  { %v1190_v19 = vrot.slane %v2781_v37, 4  ;;  %v958_v9 = vrot.slane %v957_v3, 1  ;;  %v1029_v26 = vadd.f32 %v1028_v32, %v1027_v31  ;;  %v1107_v46 = vrot.slane %v1106_v8, 2 }
 0x14f   :  { %v1476_v14 = vrot.slane %v1475_v40, 1  ;;  %v1578_v39 = vadd.f32 %v1577_v12, %v1572_v57 }
 0x150   :  { %v959_v44 = vadd.f32 %v958_v9, %v957_v3  ;;  %v1191_v5 = vadd.f32 %v2781_v37, %v1190_v19  ;;  %v1030_v28 = vrot.slane %v1029_v26, 1  ;;  %v1108_v51 = vadd.f32 %v1107_v46, %v1106_v8 }
 0x151   :  { %v1477_v45 = vmax.f32 %v1475_v40, %v1476_v14  ;;  %v1581_v13 = vrot.slane %v1578_v39, 4 }
 0x152   :  { %v2786_v49 = vpop.eup %1961  ;;  %1965 = vrcp.f32 %v959_v44  ;;  %v1031_v22 = vadd.f32 %v1030_v28, %v1029_v26  ;;  %v1109_v18 = vrot.slane %v1108_v51, 1  ;;  %v1192_v59 = vrot.slane %v1191_v5, 2 }
 0x153   :  { %v1281_v35 = vrot.slane %v2786_v49, 4  ;;  %v1478_v11 = vsub.f32 %v1471_v58, %v1477_v45  ;;  %v1582_v42 = vmax.f32 %v1578_v39, %v1581_v13 }
 0x154   :  { %1967 = vrcp.f32 %v1031_v22  ;;  %v1110_v41 = vadd.f32 %v1109_v18, %v1108_v51  ;;  %v1193_v36 = vadd.f32 %v1192_v59, %v1191_v5 }
 0x155   :  { %v1282_v24 = vadd.f32 %v2786_v49, %v1281_v35  ;;  %v1479_v23 = vmul.f32 1.442695, %v1478_v11  ;;  %v1583_v12 = vrot.slane %v1582_v42, 2 }
 0x156   :  { %v1194_v58 = vrot.slane %v1193_v36, 1 }
 0x157   :  { %v2790_v7 = vpop.eup %1963  ;;  %v1283_v48 = vrot.slane %v1282_v24, 2  ;;  %1969 = vpow2.f32 %v1479_v23  ;;  %v1584_v43 = vmax.f32 %v1582_v42, %v1583_v12 }
 0x158   :  { %v1378_v10 = vrot.slane %v2790_v7, 4  ;;  %1971 = vrcp.f32 %v1110_v41  ;;  %v1195_v50 = vadd.f32 %v1194_v58, %v1193_v36 }
 0x159   :  { %v1585_v55 = vrot.slane %v1584_v43, 1  ;;  %v1284_v63 = vadd.f32 %v1283_v48, %v1282_v24 }
 0x15a   :  { %v1379_v17 = vadd.f32 %v2790_v7, %v1378_v10  ;;  %1973 = vrcp.f32 %v1195_v50 }
 0x15b   :  { %v1586_v38 = vmax.f32 %v1584_v43, %v1585_v55  ;;  %v1285_v54 = vrot.slane %v1284_v63, 1 }
 0x15c   :  { %v1380_v34 = vrot.slane %v1379_v17, 2  ;;  %v1966_v30 = vpop.eup %1965 }
 0x15d   :  { %v1587_v31 = vsub.f32 %v1578_v39, %v1586_v38  ;;  %v1286_v29 = vadd.f32 %v1285_v54, %v1284_v63  ;;  %v961_v57 = vmul.f32 %v1966_v30, %v2768_v15 }
 0x15e   :  { %v1381_v40 = vadd.f32 %v1380_v34, %v1379_v17  ;;  %v1968_v32 = vpop.eup %1967 }
 0x15f   :  { %v1588_v3 = vmul.f32 1.442695, %v1587_v31  ;;  %1975 = vrcp.f32 %v1286_v29  ;;  %v965_v19 = vrot.slane %v961_v57, %v2229_v56  ;;  %v1033_v9 = vmul.f32 %v1968_v32, %v2773_v53 }
 0x160   :  { %v1382_v8 = vrot.slane %v1381_v40, 1 }
 0x161   :  { %v2796_v14 = vpop.eup %1969  ;;  %1977 = vpow2.f32 %v1588_v3  ;;  %v966_v45 = vmul.f32 %v965_v19, %v2264_v21  ;;  %v1037_v13 = vrot.slane %v1033_v9, %v2229_v56  ;;  %v1042_v15 = vrot.slane %v1033_v9, %v2234_v60 }
 0x162   :  { %v1972_v26 = vpop.eup %1971  ;;  %v1383_v46 = vadd.f32 %v1382_v8, %v1381_v40  ;;  %v1481_v39 = vrot.slane %v2796_v14, 4 }
 0x163   :  { %v1112_v44 = vmul.f32 %v1972_v26, %v2777_v33  ;;  %967 = vst [vmem:[%s2908_s2] sm:$0xff] %v966_v45  ;;  %v1038_v53 = vmul.f32 %v1037_v13, %v2264_v21  ;;  %v1043_v28 = vmul.f32 %v1042_v15, %v2269_v27 }
 0x164   :  { %1979 = vrcp.f32 %v1383_v46  ;;  %v1482_v5 = vadd.f32 %v2796_v14, %v1481_v39  ;;  %v1974_v11 = vpop.eup %1973 }
 0x165   :  { %v1116_v51 = vrot.slane %v1112_v44, %v2229_v56  ;;  %v1121_v35 = vrot.slane %v1112_v44, %v2234_v60  ;;  %v1127_v42 = vrot.slane %v1112_v44, %v2237_v61  ;;  %v1044_v33 = vadd.f32 %v1043_v28, %v1038_v53 }
 0x166   :  { %v1483_v22 = vrot.slane %v1482_v5, 2  ;;  %v1197_v24 = vmul.f32 %v1974_v11, %v2781_v37 }
 0x167   :  { %v1117_v18 = vmul.f32 %v1116_v51, %v2264_v21  ;;  %v1122_v59 = vmul.f32 %v1121_v35, %v2269_v27  ;;  %v1128_v23 = vmul.f32 %v1127_v42, %v2333_v52  ;;  %1703 = vst [vmem:[%s2908_s2 + $0x8] sm:$0xff] %v1044_v33 }
 0x168   :  { %v1484_v12 = vadd.f32 %v1483_v22, %v1482_v5  ;;  %v1201_v48 = vrot.slane %v1197_v24, %v2229_v56  ;;  %v1206_v43 = vrot.slane %v1197_v24, %v2234_v60  ;;  %v1212_v10 = vrot.slane %v1197_v24, %v2237_v61 }
 0x169   :  { %v1976_v41 = vpop.eup %1975  ;;  %v1123_v36 = vadd.f32 %v1122_v59, %v1117_v18  ;;  %v1218_v58 = vrot.slane %v1197_v24, %v2240_v62 }
 0x16a   :  { %v1288_v55 = vmul.f32 %v1976_v41, %v2786_v49  ;;  %v1485_v37 = vrot.slane %v1484_v12, 1  ;;  %v1202_v50 = vmul.f32 %v1201_v48, %v2264_v21  ;;  %v1207_v38 = vmul.f32 %v1206_v43, %v2269_v27 }
 0x16b   :  { %v2825_v63 = vpop.eup %1977  ;;  %v1129_v17 = vadd.f32 %v1128_v23, %v1123_v36  ;;  %v1213_v54 = vmul.f32 %v1212_v10, %v2333_v52  ;;  %v1219_v34 = vmul.f32 %v1218_v58, %v2338_v25 }
 0x16c   :  { %v1292_v30 = vrot.slane %v1288_v55, %v2229_v56  ;;  %v1297_v31 = vrot.slane %v1288_v55, %v2234_v60  ;;  %v1303_v29 = vrot.slane %v1288_v55, %v2237_v61  ;;  %v1208_v49 = vadd.f32 %v1207_v38, %v1202_v50 }
 0x16d   :  { %1704 = vst [vmem:[%s2908_s2 + $0x10] sm:$0xff] %v1129_v17  ;;  %v1309_v40 = vrot.slane %v1288_v55, %v2240_v62  ;;  %v1315_v57 = vrot.slane %v1288_v55, %v2243_v0  ;;  %v1486_v3 = vadd.f32 %v1485_v37, %v1484_v12  ;;  %v1590_v26 = vrot.slane %v2825_v63, 4 }
 0x16e   :  { %v1980_v32 = vpop.eup %1979  ;;  %v1293_v8 = vmul.f32 %v1292_v30, %v2264_v21  ;;  %v1298_v19 = vmul.f32 %v1297_v31, %v2269_v27  ;;  %v1304_v9 = vmul.f32 %v1303_v29, %v2333_v52  ;;  %v1214_v46 = vadd.f32 %v1213_v54, %v1208_v49 }
 0x16f   :  { %v1310_v45 = vmul.f32 %v1309_v40, %v2338_v25  ;;  %v1316_v39 = vmul.f32 %v1315_v57, %v2395_v6  ;;  %v1385_v13 = vmul.f32 %v1980_v32, %v2790_v7  ;;  %1981 = vrcp.f32 %v1486_v3 }
 0x170   :  { %v1299_v15 = vadd.f32 %v1298_v19, %v1293_v8  ;;  %v1591_v44 = vadd.f32 %v2825_v63, %v1590_v26  ;;  %v1220_v5 = vadd.f32 %v1219_v34, %v1214_v46 }
 0x171   :  { %v1389_v53 = vrot.slane %v1385_v13, %v2229_v56  ;;  %v1394_v28 = vrot.slane %v1385_v13, %v2234_v60  ;;  %v1400_v51 = vrot.slane %v1385_v13, %v2237_v61  ;;  %v1406_v11 = vrot.slane %v1385_v13, %v2240_v62 }
 0x172   :  { %v1305_v35 = vadd.f32 %v1304_v9, %v1299_v15  ;;  %v1412_v42 = vrot.slane %v1385_v13, %v2243_v0  ;;  %v1418_v22 = vrot.slane %v1385_v13, %v2246_v1  ;;  %1705 = vst [vmem:[%s2908_s2 + $0x18] sm:$0xff] %v1220_v5  ;;  %v1592_v59 = vrot.slane %v1591_v44, 2 }
 0x173   :  { %v1390_v7 = vmul.f32 %v1389_v53, %v2264_v21  ;;  %v1395_v33 = vmul.f32 %v1394_v28, %v2269_v27  ;;  %v1401_v18 = vmul.f32 %v1400_v51, %v2333_v52  ;;  %v1407_v23 = vmul.f32 %v1406_v11, %v2338_v25 }
 0x174   :  { %v1311_v24 = vadd.f32 %v1310_v45, %v1305_v35  ;;  %v1413_v12 = vmul.f32 %v1412_v42, %v2395_v6  ;;  %v1419_v41 = vmul.f32 %v1418_v22, %v2400_v47  ;;  %v1593_v48 = vadd.f32 %v1592_v59, %v1591_v44 }
 0x175   :  { %v1396_v36 = vadd.f32 %v1395_v33, %v1390_v7 }
 0x176   :  { %v1317_v43 = vadd.f32 %v1316_v39, %v1311_v24  ;;  %v1594_v58 = vrot.slane %v1593_v48, 1 }
 0x177   :  { %v1402_v10 = vadd.f32 %v1401_v18, %v1396_v36 }
 0x178   :  { %1706 = vst [vmem:[%s2908_s2 + $0x20] sm:$0xff] %v1317_v43  ;;  %v1595_v37 = vadd.f32 %v1594_v58, %v1593_v48 }
 0x179   :  { %v1408_v55 = vadd.f32 %v1407_v23, %v1402_v10  ;;  %v1982_v17 = vpop.eup %1981 }
 0x17a   :  { %v1488_v38 = vmul.f32 %v1982_v17, %v2796_v14  ;;  %1983 = vrcp.f32 %v1595_v37 }
 0x17b   :  { %v1414_v50 = vadd.f32 %v1413_v12, %v1408_v55 }
 0x17c   :  { %v1492_v34 = vrot.slane %v1488_v38, %v2229_v56  ;;  %v1497_v30 = vrot.slane %v1488_v38, %v2234_v60  ;;  %v1503_v31 = vrot.slane %v1488_v38, %v2237_v61  ;;  %v1509_v29 = vrot.slane %v1488_v38, %v2240_v62 }
 0x17d   :  { %v1420_v54 = vadd.f32 %v1419_v41, %v1414_v50  ;;  %v1515_v49 = vrot.slane %v1488_v38, %v2243_v0  ;;  %v1521_v40 = vrot.slane %v1488_v38, %v2246_v1  ;;  %v1527_v57 = vrot.slane %v1488_v38, %v2249_v2 }
 0x17e   :  { %v1493_v14 = vmul.f32 %v1492_v34, %v2264_v21  ;;  %v1498_v3 = vmul.f32 %v1497_v30, %v2269_v27  ;;  %v1504_v32 = vmul.f32 %v1503_v31, %v2333_v52  ;;  %v1510_v8 = vmul.f32 %v1509_v29, %v2338_v25 }
 0x17f   :  { %1707 = vst [vmem:[%s2908_s2 + $0x28] sm:$0xff] %v1420_v54  ;;  %v1516_v19 = vmul.f32 %v1515_v49, %v2395_v6  ;;  %v1522_v9 = vmul.f32 %v1521_v40, %v2400_v47  ;;  %v1528_v26 = vmul.f32 %v1527_v57, %v2457_v16 }
 0x180   :  { %v1499_v46 = vadd.f32 %v1498_v3, %v1493_v14 }
 0x182   :  { %v1505_v45 = vadd.f32 %v1504_v32, %v1499_v46 }
 0x184   :  { %v1984_v39 = vpop.eup %1983  ;;  %v1511_v13 = vadd.f32 %v1510_v8, %v1505_v45 }
 0x185   :  { %v1597_v15 = vmul.f32 %v1984_v39, %v2825_v63 }
 0x186   :  { %v1517_v44 = vadd.f32 %v1516_v19, %v1511_v13 }
 0x187   :  { %v1601_v5 = vrot.slane %v1597_v15, %v2229_v56  ;;  %v1606_v53 = vrot.slane %v1597_v15, %v2234_v60  ;;  %v1612_v28 = vrot.slane %v1597_v15, %v2237_v61  ;;  %v1618_v51 = vrot.slane %v1597_v15, %v2240_v62 }
 0x188   :  { %v1523_v35 = vadd.f32 %v1522_v9, %v1517_v44  ;;  %v1624_v11 = vrot.slane %v1597_v15, %v2243_v0  ;;  %v1630_v42 = vrot.slane %v1597_v15, %v2246_v1  ;;  %v1636_v22 = vrot.slane %v1597_v15, %v2249_v2 }
 0x189   :  { %v1602_v7 = vmul.f32 %v1601_v5, %v2264_v21  ;;  %v1607_v63 = vmul.f32 %v1606_v53, %v2269_v27  ;;  %v1613_v33 = vmul.f32 %v1612_v28, %v2333_v52  ;;  %v1619_v56 = vmul.f32 %v1618_v51, %v2338_v25 }
 0x18a   :  { %v1529_v60 = vadd.f32 %v1528_v26, %v1523_v35  ;;  %v1625_v61 = vmul.f32 %v1624_v11, %v2395_v6  ;;  %v1631_v62 = vmul.f32 %v1630_v42, %v2400_v47  ;;  %v1637_v18 = vmul.f32 %v1636_v22, %v2457_v16 }
 0x18b   :  { %v1608_v0 = vadd.f32 %v1607_v63, %v1602_v7  ;;  %v1642_v1 = vrot.slane %v1597_v15, %v2252_v4 }
 0x18c   :  { %1708 = vst [vmem:[%s2908_s2 + $0x30] sm:$0xff] %v1529_v60 }
 0x18d   :  { %v1614_v2 = vadd.f32 %v1613_v33, %v1608_v0  ;;  %v1643_v21 = vmul.f32 %v1642_v1, %v2460_v20 }
 0x18f   :  { %v1620_v27 = vadd.f32 %v1619_v56, %v1614_v2 }
 0x191   :  { %v1626_v52 = vadd.f32 %v1625_v61, %v1620_v27 }
 0x193   :  { %v1632_v25 = vadd.f32 %v1631_v62, %v1626_v52 }
 0x195   :  { %v1638_v59 = vadd.f32 %v1637_v18, %v1632_v25 }
 0x197   :  { %v1644_v24 = vadd.f32 %v1643_v21, %v1638_v59 }
 0x199   :  { %1709 = vst [vmem:[%s2908_s2 + $0x38] sm:$0xff] %v1644_v24 }

</bundles_post_ra>
